<compile_context>
chip_gen: v7x
topology: tpu7x:2x2x1
jax: 0.10.0
libtpu: 0.0.40
codegen_flags: <defaults>
</compile_context>

<pallas_src>
import functools

import jax
import jax.numpy as jnp
from jax import lax
from jax.experimental import pallas as pl
from jax.experimental.pallas import tpu as pltpu


# Contract the minor dim of both operands:  (M, K) . (N, K)^T -> (M, N).
_MINOR_MINOR = (((1,), (1,)), ((), ()))


# ----------------------------------------------------------------------------
# Fused SDNet forward kernel (emb_size > 1 path)
# ----------------------------------------------------------------------------
def _sdnet_fused_kernel(x_ref, w1at_ref, b1a_ref, w1bt_ref,
                        w2at_ref, b2a_ref, w2bt_ref, b2b_ref,
                        o_ref, e2_ref, *, in_size, emb_size):
    # x_ref  : (bt, in_size*emb)  batch in sublanes, feature-blocked lanes
    # w1at   : (H1, emb)     b1a : (H1, 1)     w1bt : (1, H1)
    # w2at   : (H2, in_size) b2a : (H2, 1)     (b1b already folded in)
    # w2bt   : (1, H2)       b2b : (1, 1) scalar in SMEM
    # o_ref  : (1, bt)  lane-dense output
    # e2_ref : (in_size, bt) VMEM scratch holding the layers1 output
    f32 = jnp.float32
    x = x_ref[...]                                    # read the tile once
    w1at = w1at_ref[...]
    b1a = b1a_ref[...]
    w1bt = w1bt_ref[...]

    for i in range(in_size):                          # static, unrolled
        xi = x[:, i * emb_size:(i + 1) * emb_size]    # (bt, emb)
        # (H1, emb) . (bt, emb)^T -> (H1, bt): samples land in the 128 lanes.
        h1 = lax.dot_general(w1at, xi, _MINOR_MINOR, preferred_element_type=f32)
        h1 = jnp.maximum(h1 + b1a, 0.0)
        ei = jnp.dot(w1bt, h1, preferred_element_type=f32)   # (1, bt)
        e2_ref[pl.ds(i, 1), :] = ei.astype(e2_ref.dtype)

    # layers2, transposed: (H2, in_size) @ (in_size, bt) -> ... -> (1, bt)
    h2 = jnp.dot(w2at_ref[...], e2_ref[...], preferred_element_type=f32)
    h2 = jnp.maximum(h2 + b2a_ref[...], 0.0)
    y = jnp.dot(w2bt_ref[...], h2, preferred_element_type=f32) + b2b_ref[0, 0]
    o_ref[...] = y.astype(o_ref.dtype)


# ----------------------------------------------------------------------------
# layers2-only kernel (emb_size == 1 path: layers1 is Identity)
# ----------------------------------------------------------------------------
def _sdnet_layers2_kernel(x_ref, w2at_ref, b2a_ref, w2bt_ref, b2b_ref, o_ref):
    # x_ref : (bt, in_size)   output (1, bt), lane-dense.
    f32 = jnp.float32
    h2 = lax.dot_general(w2at_ref[...], x_ref[...], _MINOR_MINOR,
                         preferred_element_type=f32)          # (H2, bt)
    h2 = jnp.maximum(h2 + b2a_ref[...], 0.0)
    y = jnp.dot(w2bt_ref[...], h2, preferred_element_type=f32) + b2b_ref[0, 0]
    o_ref[...] = y.astype(o_ref.dtype)


# ----------------------------------------------------------------------------
# Parameter construction (deterministic, PyTorch-Linear-style uniform init)
# ----------------------------------------------------------------------------
def _linear_params(key, fan_in, fan_out, dtype=jnp.float32):
    kw, kb = jax.random.split(key)
    bound = 1.0 / jnp.sqrt(float(fan_in))
    w = jax.random.uniform(kw, (fan_in, fan_out), dtype, -bound, bound)  # (in, out)
    b = jax.random.uniform(kb, (1, fan_out), dtype, -bound, bound)
    return w, b


def make_sdnet_params(key, in_size, emb_size, hid_size):
    k1, k2, k3, k4 = jax.random.split(key, 4)
    w1a, b1a = _linear_params(k1, max(emb_size, 1), hid_size)  # layers1: Linear(emb, H1)
    w1b, b1b = _linear_params(k2, hid_size, 1)                 # layers1: Linear(H1, 1)
    w2a, b2a = _linear_params(k3, in_size, hid_size)           # layers2: Linear(in, H2)
    w2b, b2b = _linear_params(k4, hid_size, 1)                 # layers2: Linear(H2, 1)
    return dict(w1a=w1a, b1a=b1a, w1b=w1b, b1b=b1b,
                w2a=w2a, b2a=b2a, w2b=w2b, b2b=b2b)


# ----------------------------------------------------------------------------
# SDNet.forward
# ----------------------------------------------------------------------------
@functools.partial(jax.jit,
                   static_argnames=("in_size", "emb_size", "batch_tile",
                                    "compute_dtype"))
def sdnet_forward(x, params, *, in_size, emb_size, batch_tile=None,
                  compute_dtype=jnp.float32):
    B = x.shape[0]
    out_dtype = x.dtype
    cdt = compute_dtype   # jnp.bfloat16 recommended on v6e / v7x

    # ---- batch tiling -------------------------------------------------------
    if batch_tile is None or batch_tile >= B:
        bt = B
    else:
        bt = batch_tile
        assert B % bt == 0, "batch_tile must divide B"
        assert bt % 128 == 0, ("batch_tile must be a multiple of 128 so the "
                               "lane-dense (1, bt) output block is tileable")
    num_tiles = B // bt
    compiler_params = pltpu.CompilerParams(
        # >1 tile: shard the batch axis across TensorCores (v7x has 2 per chip).
        dimension_semantics=("parallel",) if num_tiles > 1 else ("arbitrary",))

    # ---- layers2 params, transposed; fold layers1's output bias b1b in ------
    if emb_size > 1:
        b2a_eff = params["b2a"] + params["b1b"] * jnp.sum(
            params["w2a"], axis=0, keepdims=True)
    else:
        b2a_eff = params["b2a"]
    w2at = params["w2a"].T.astype(cdt)             # (H2, in_size)
    b2at = b2a_eff.T.astype(jnp.float32)           # (H2, 1)
    w2bt = params["w2b"].T.astype(cdt)             # (1, H2)
    b2b = params["b2b"].astype(jnp.float32)        # (1, 1) -> SMEM
    H2 = w2at.shape[0]

    smem_spec = pl.BlockSpec(memory_space=pltpu.MemorySpace.SMEM)

    if emb_size <= 1:
        x2 = x.reshape(B, in_size).astype(cdt)
        out = pl.pallas_call(
            _sdnet_layers2_kernel,
            out_shape=jax.ShapeDtypeStruct((1, B), out_dtype),
            grid=(num_tiles,),
            in_specs=[pl.BlockSpec((bt, in_size), lambda t: (t, 0)),
                      pl.BlockSpec((H2, in_size), lambda t: (0, 0)),
                      pl.BlockSpec((H2, 1), lambda t: (0, 0)),
                      pl.BlockSpec((1, H2), lambda t: (0, 0)),
                      smem_spec],
            out_specs=pl.BlockSpec((1, bt), lambda t: (0, t)),
            compiler_params=compiler_params,
        )(x2, w2at, b2at, w2bt, b2b)
        return out.reshape(B, 1)

    # ---- emb_size > 1: fused layers1 + regroup + layers2 --------------------
    H1 = params["w1a"].shape[1]
    F = in_size * emb_size
    # Free, contiguity-preserving reshape (no HBM transpose): row b holds
    # lanes [i*emb, (i+1)*emb) = feature i's embedding.
    x2 = x.reshape(B, F).astype(cdt)
    w1at = params["w1a"].T.astype(cdt)             # (H1, emb)
    b1at = params["b1a"].T.astype(jnp.float32)     # (H1, 1)
    w1bt = params["w1b"].T.astype(cdt)             # (1, H1)

    kernel = functools.partial(_sdnet_fused_kernel,
                               in_size=in_size, emb_size=emb_size)
    out = pl.pallas_call(
        kernel,
        out_shape=jax.ShapeDtypeStruct((1, B), out_dtype),
        grid=(num_tiles,),
        in_specs=[
            pl.BlockSpec((bt, F), lambda t: (t, 0)),
            pl.BlockSpec((H1, emb_size), lambda t: (0, 0)),
            pl.BlockSpec((H1, 1), lambda t: (0, 0)),
            pl.BlockSpec((1, H1), lambda t: (0, 0)),
            pl.BlockSpec((H2, in_size), lambda t: (0, 0)),
            pl.BlockSpec((H2, 1), lambda t: (0, 0)),
            pl.BlockSpec((1, H2), lambda t: (0, 0)),
            smem_spec,
        ],
        out_specs=pl.BlockSpec((1, bt), lambda t: (0, t)),
        scratch_shapes=[pltpu.VMEM((in_size, bt), cdt)],
        compiler_params=compiler_params,
    )(x2, w1at, b1at, w1bt, w2at, b2at, w2bt, b2b)
    return out.reshape(B, 1)


# Pure-JAX reference for verification
def sdnet_forward_ref(x, params, in_size, emb_size):
    def mlp(z, wa, ba, wb, bb):
        return jnp.maximum(z @ wa + ba, 0.0) @ wb + bb
    if emb_size > 1:
        z = x.reshape(-1, emb_size)
        z = mlp(z, params["w1a"], params["b1a"], params["w1b"], params["b1b"])
        x = z.reshape(-1, in_size)
    return mlp(x, params["w2a"], params["b2a"], params["w2b"], params["b2b"])


# TODO(synk): loss / gradient_penalty / fit are autograd + Adam training loops
# (host-side optimization logic), not part of the forward-pass kernel.

if __name__ == "__main__":
    B, IN_SIZE, EMB_SIZE, HID = 8, 16, 4, 32

    key = jax.random.PRNGKey(0)
    kx, kx1, kp, kp1 = jax.random.split(key, 4)

    # emb_size > 1 path: fused layers1 + reshape + layers2 kernel
    x = jax.random.normal(kx, (B, IN_SIZE, EMB_SIZE), jnp.float32)
    params = make_sdnet_params(kp, IN_SIZE, EMB_SIZE, HID)
    out = jax.block_until_ready(
        sdnet_forward(x, params, in_size=IN_SIZE, emb_size=EMB_SIZE))
    ref = sdnet_forward_ref(x, params, IN_SIZE, EMB_SIZE)
    assert out.shape == (B, 1)
    assert jnp.allclose(out, ref, atol=1e-4, rtol=1e-4), \
        float(jnp.max(jnp.abs(out - ref)))

    # emb_size == 1 path: layers1 is Identity, layers2-only kernel
    x1 = jax.random.normal(kx1, (B, IN_SIZE), jnp.float32)
    params1 = make_sdnet_params(kp1, IN_SIZE, 1, HID)
    out1 = jax.block_until_ready(
        sdnet_forward(x1, params1, in_size=IN_SIZE, emb_size=1))
    ref1 = sdnet_forward_ref(x1, params1, IN_SIZE, 1)
    assert out1.shape == (B, 1)
    assert jnp.allclose(out1, ref1, atol=1e-4, rtol=1e-4), \
        float(jnp.max(jnp.abs(out1 - ref1)))

    print("KERNEL_OK")
</pallas_src>

<mosaic_0001>
module attributes {stable_mosaic.version = 11 : i64} {
  func.func @_sdnet_fused_kernel(%arg0: i32, %arg1: memref<8x64xf32, #tpu.memory_space<vmem>>, %arg2: memref<32x4xf32, #tpu.memory_space<vmem>>, %arg3: memref<32x1xf32, #tpu.memory_space<vmem>>, %arg4: memref<1x32xf32, #tpu.memory_space<vmem>>, %arg5: memref<32x16xf32, #tpu.memory_space<vmem>>, %arg6: memref<32x1xf32, #tpu.memory_space<vmem>>, %arg7: memref<1x32xf32, #tpu.memory_space<vmem>>, %arg8: memref<1x1xf32, #tpu.memory_space<smem>>, %arg9: memref<1x8xf32, #tpu.memory_space<vmem>>, %arg10: memref<16x8xf32, #tpu.memory_space<vmem>>) attributes {dimension_semantics = [#tpu.dimension_semantics<arbitrary>], iteration_bounds = array<i64: 1>, scalar_prefetch = 0 : i64, scratch_operands = 1 : i64, tpu.core_type = #tpu.core_type<tc>, window_params = [{transform_indices = @transform_0, window_bounds = array<i64: 8, 64>}, {pipeline_mode = #tpu.pipeline_mode<synchronous>, transform_indices = @transform_1, window_bounds = array<i64: 32, 4>}, {pipeline_mode = #tpu.pipeline_mode<synchronous>, transform_indices = @transform_2, window_bounds = array<i64: 32, 1>}, {pipeline_mode = #tpu.pipeline_mode<synchronous>, transform_indices = @transform_3, window_bounds = array<i64: 1, 32>}, {pipeline_mode = #tpu.pipeline_mode<synchronous>, transform_indices = @transform_4, window_bounds = array<i64: 32, 16>}, {pipeline_mode = #tpu.pipeline_mode<synchronous>, transform_indices = @transform_5, window_bounds = array<i64: 32, 1>}, {pipeline_mode = #tpu.pipeline_mode<synchronous>, transform_indices = @transform_6, window_bounds = array<i64: 1, 32>}, {transform_indices = @transform_7, window_bounds = array<i64: 1, 1>}, {transform_indices = @transform_8, window_bounds = array<i64: 1, 8>}]} {
    %c0 = arith.constant 0 : index
    %c0_0 = arith.constant 0 : index
    %0 = vector.load %arg1[%c0, %c0_0] : memref<8x64xf32, #tpu.memory_space<vmem>>, vector<8x64xf32>
    %c0_1 = arith.constant 0 : index
    %c0_2 = arith.constant 0 : index
    %1 = vector.load %arg2[%c0_1, %c0_2] : memref<32x4xf32, #tpu.memory_space<vmem>>, vector<32x4xf32>
    %c0_3 = arith.constant 0 : index
    %c0_4 = arith.constant 0 : index
    %2 = vector.load %arg3[%c0_3, %c0_4] : memref<32x1xf32, #tpu.memory_space<vmem>>, vector<32x1xf32>
    %c0_5 = arith.constant 0 : index
    %c0_6 = arith.constant 0 : index
    %3 = vector.load %arg4[%c0_5, %c0_6] : memref<1x32xf32, #tpu.memory_space<vmem>>, vector<1x32xf32>
    %4 = vector.extract_strided_slice %0 {offsets = [0, 0], sizes = [8, 4], strides = [1, 1]} : vector<8x64xf32> to vector<8x4xf32>
    %cst = arith.constant dense<0.000000e+00> : vector<32x8xf32>
    %5 = tpu.matmul %1, %4, %cst {dimension_numbers = #tpu.dot_dimension_numbers<[1], [1], [0], [0], [0, 0, 1, 0], [], []>} : vector<32x4xf32>, vector<8x4xf32>, vector<32x8xf32> -> vector<32x8xf32>
    %6 = vector.broadcast %2 : vector<32x1xf32> to vector<32x8xf32>
    %7 = arith.addf %5, %6 : vector<32x8xf32>
    %cst_7 = arith.constant 0.000000e+00 : f32
    %8 = vector.broadcast %cst_7 : f32 to vector<32x8xf32>
    %9 = arith.maximumf %7, %8 : vector<32x8xf32>
    %cst_8 = arith.constant dense<0.000000e+00> : vector<1x8xf32>
    %10 = tpu.matmul %3, %9, %cst_8 {dimension_numbers = #tpu.dot_dimension_numbers<[1], [0], [0], [1], [0, 0, 1, 1], [], []>} : vector<1x32xf32>, vector<32x8xf32>, vector<1x8xf32> -> vector<1x8xf32>
    %c0_9 = arith.constant 0 : index
    %c0_10 = arith.constant 0 : index
    %11 = vector.load %arg10[%c0_9, %c0_10] : memref<16x8xf32, #tpu.memory_space<vmem>>, vector<1x8xf32>
    tpu.vector_store %arg10[%c0_9, %c0_10], %10 {strides = array<i32>} : memref<16x8xf32, #tpu.memory_space<vmem>>, vector<1x8xf32>,
    %12 = vector.extract_strided_slice %0 {offsets = [0, 4], sizes = [8, 4], strides = [1, 1]} : vector<8x64xf32> to vector<8x4xf32>
    %cst_11 = arith.constant dense<0.000000e+00> : vector<32x8xf32>
    %13 = tpu.matmul %1, %12, %cst_11 {dimension_numbers = #tpu.dot_dimension_numbers<[1], [1], [0], [0], [0, 0, 1, 0], [], []>} : vector<32x4xf32>, vector<8x4xf32>, vector<32x8xf32> -> vector<32x8xf32>
    %14 = vector.broadcast %2 : vector<32x1xf32> to vector<32x8xf32>
    %15 = arith.addf %13, %14 : vector<32x8xf32>
    %cst_12 = arith.constant 0.000000e+00 : f32
    %16 = vector.broadcast %cst_12 : f32 to vector<32x8xf32>
    %17 = arith.maximumf %15, %16 : vector<32x8xf32>
    %cst_13 = arith.constant dense<0.000000e+00> : vector<1x8xf32>
    %18 = tpu.matmul %3, %17, %cst_13 {dimension_numbers = #tpu.dot_dimension_numbers<[1], [0], [0], [1], [0, 0, 1, 1], [], []>} : vector<1x32xf32>, vector<32x8xf32>, vector<1x8xf32> -> vector<1x8xf32>
    %c1 = arith.constant 1 : index
    %c0_14 = arith.constant 0 : index
    %19 = vector.load %arg10[%c1, %c0_14] : memref<16x8xf32, #tpu.memory_space<vmem>>, vector<1x8xf32>
    tpu.vector_store %arg10[%c1, %c0_14], %18 {strides = array<i32>} : memref<16x8xf32, #tpu.memory_space<vmem>>, vector<1x8xf32>,
    %20 = vector.extract_strided_slice %0 {offsets = [0, 8], sizes = [8, 4], strides = [1, 1]} : vector<8x64xf32> to vector<8x4xf32>
    %cst_15 = arith.constant dense<0.000000e+00> : vector<32x8xf32>
    %21 = tpu.matmul %1, %20, %cst_15 {dimension_numbers = #tpu.dot_dimension_numbers<[1], [1], [0], [0], [0, 0, 1, 0], [], []>} : vector<32x4xf32>, vector<8x4xf32>, vector<32x8xf32> -> vector<32x8xf32>
    %22 = vector.broadcast %2 : vector<32x1xf32> to vector<32x8xf32>
    %23 = arith.addf %21, %22 : vector<32x8xf32>
    %cst_16 = arith.constant 0.000000e+00 : f32
    %24 = vector.broadcast %cst_16 : f32 to vector<32x8xf32>
    %25 = arith.maximumf %23, %24 : vector<32x8xf32>
    %cst_17 = arith.constant dense<0.000000e+00> : vector<1x8xf32>
    %26 = tpu.matmul %3, %25, %cst_17 {dimension_numbers = #tpu.dot_dimension_numbers<[1], [0], [0], [1], [0, 0, 1, 1], [], []>} : vector<1x32xf32>, vector<32x8xf32>, vector<1x8xf32> -> vector<1x8xf32>
    %c2 = arith.constant 2 : index
    %c0_18 = arith.constant 0 : index
    %27 = vector.load %arg10[%c2, %c0_18] : memref<16x8xf32, #tpu.memory_space<vmem>>, vector<1x8xf32>
    tpu.vector_store %arg10[%c2, %c0_18], %26 {strides = array<i32>} : memref<16x8xf32, #tpu.memory_space<vmem>>, vector<1x8xf32>,
    %28 = vector.extract_strided_slice %0 {offsets = [0, 12], sizes = [8, 4], strides = [1, 1]} : vector<8x64xf32> to vector<8x4xf32>
    %cst_19 = arith.constant dense<0.000000e+00> : vector<32x8xf32>
    %29 = tpu.matmul %1, %28, %cst_19 {dimension_numbers = #tpu.dot_dimension_numbers<[1], [1], [0], [0], [0, 0, 1, 0], [], []>} : vector<32x4xf32>, vector<8x4xf32>, vector<32x8xf32> -> vector<32x8xf32>
    %30 = vector.broadcast %2 : vector<32x1xf32> to vector<32x8xf32>
    %31 = arith.addf %29, %30 : vector<32x8xf32>
    %cst_20 = arith.constant 0.000000e+00 : f32
    %32 = vector.broadcast %cst_20 : f32 to vector<32x8xf32>
    %33 = arith.maximumf %31, %32 : vector<32x8xf32>
    %cst_21 = arith.constant dense<0.000000e+00> : vector<1x8xf32>
    %34 = tpu.matmul %3, %33, %cst_21 {dimension_numbers = #tpu.dot_dimension_numbers<[1], [0], [0], [1], [0, 0, 1, 1], [], []>} : vector<1x32xf32>, vector<32x8xf32>, vector<1x8xf32> -> vector<1x8xf32>
    %c3 = arith.constant 3 : index
    %c0_22 = arith.constant 0 : index
    %35 = vector.load %arg10[%c3, %c0_22] : memref<16x8xf32, #tpu.memory_space<vmem>>, vector<1x8xf32>
    tpu.vector_store %arg10[%c3, %c0_22], %34 {strides = array<i32>} : memref<16x8xf32, #tpu.memory_space<vmem>>, vector<1x8xf32>,
    %36 = vector.extract_strided_slice %0 {offsets = [0, 16], sizes = [8, 4], strides = [1, 1]} : vector<8x64xf32> to vector<8x4xf32>
    %cst_23 = arith.constant dense<0.000000e+00> : vector<32x8xf32>
    %37 = tpu.matmul %1, %36, %cst_23 {dimension_numbers = #tpu.dot_dimension_numbers<[1], [1], [0], [0], [0, 0, 1, 0], [], []>} : vector<32x4xf32>, vector<8x4xf32>, vector<32x8xf32> -> vector<32x8xf32>
    %38 = vector.broadcast %2 : vector<32x1xf32> to vector<32x8xf32>
    %39 = arith.addf %37, %38 : vector<32x8xf32>
    %cst_24 = arith.constant 0.000000e+00 : f32
    %40 = vector.broadcast %cst_24 : f32 to vector<32x8xf32>
    %41 = arith.maximumf %39, %40 : vector<32x8xf32>
    %cst_25 = arith.constant dense<0.000000e+00> : vector<1x8xf32>
    %42 = tpu.matmul %3, %41, %cst_25 {dimension_numbers = #tpu.dot_dimension_numbers<[1], [0], [0], [1], [0, 0, 1, 1], [], []>} : vector<1x32xf32>, vector<32x8xf32>, vector<1x8xf32> -> vector<1x8xf32>
    %c4 = arith.constant 4 : index
    %c0_26 = arith.constant 0 : index
    %43 = vector.load %arg10[%c4, %c0_26] : memref<16x8xf32, #tpu.memory_space<vmem>>, vector<1x8xf32>
    tpu.vector_store %arg10[%c4, %c0_26], %42 {strides = array<i32>} : memref<16x8xf32, #tpu.memory_space<vmem>>, vector<1x8xf32>,
    %44 = vector.extract_strided_slice %0 {offsets = [0, 20], sizes = [8, 4], strides = [1, 1]} : vector<8x64xf32> to vector<8x4xf32>
    %cst_27 = arith.constant dense<0.000000e+00> : vector<32x8xf32>
    %45 = tpu.matmul %1, %44, %cst_27 {dimension_numbers = #tpu.dot_dimension_numbers<[1], [1], [0], [0], [0, 0, 1, 0], [], []>} : vector<32x4xf32>, vector<8x4xf32>, vector<32x8xf32> -> vector<32x8xf32>
    %46 = vector.broadcast %2 : vector<32x1xf32> to vector<32x8xf32>
    %47 = arith.addf %45, %46 : vector<32x8xf32>
    %cst_28 = arith.constant 0.000000e+00 : f32
    %48 = vector.broadcast %cst_28 : f32 to vector<32x8xf32>
    %49 = arith.maximumf %47, %48 : vector<32x8xf32>
    %cst_29 = arith.constant dense<0.000000e+00> : vector<1x8xf32>
    %50 = tpu.matmul %3, %49, %cst_29 {dimension_numbers = #tpu.dot_dimension_numbers<[1], [0], [0], [1], [0, 0, 1, 1], [], []>} : vector<1x32xf32>, vector<32x8xf32>, vector<1x8xf32> -> vector<1x8xf32>
    %c5 = arith.constant 5 : index
    %c0_30 = arith.constant 0 : index
    %51 = vector.load %arg10[%c5, %c0_30] : memref<16x8xf32, #tpu.memory_space<vmem>>, vector<1x8xf32>
    tpu.vector_store %arg10[%c5, %c0_30], %50 {strides = array<i32>} : memref<16x8xf32, #tpu.memory_space<vmem>>, vector<1x8xf32>,
    %52 = vector.extract_strided_slice %0 {offsets = [0, 24], sizes = [8, 4], strides = [1, 1]} : vector<8x64xf32> to vector<8x4xf32>
    %cst_31 = arith.constant dense<0.000000e+00> : vector<32x8xf32>
    %53 = tpu.matmul %1, %52, %cst_31 {dimension_numbers = #tpu.dot_dimension_numbers<[1], [1], [0], [0], [0, 0, 1, 0], [], []>} : vector<32x4xf32>, vector<8x4xf32>, vector<32x8xf32> -> vector<32x8xf32>
    %54 = vector.broadcast %2 : vector<32x1xf32> to vector<32x8xf32>
    %55 = arith.addf %53, %54 : vector<32x8xf32>
    %cst_32 = arith.constant 0.000000e+00 : f32
    %56 = vector.broadcast %cst_32 : f32 to vector<32x8xf32>
    %57 = arith.maximumf %55, %56 : vector<32x8xf32>
    %cst_33 = arith.constant dense<0.000000e+00> : vector<1x8xf32>
    %58 = tpu.matmul %3, %57, %cst_33 {dimension_numbers = #tpu.dot_dimension_numbers<[1], [0], [0], [1], [0, 0, 1, 1], [], []>} : vector<1x32xf32>, vector<32x8xf32>, vector<1x8xf32> -> vector<1x8xf32>
    %c6 = arith.constant 6 : index
    %c0_34 = arith.constant 0 : index
    %59 = vector.load %arg10[%c6, %c0_34] : memref<16x8xf32, #tpu.memory_space<vmem>>, vector<1x8xf32>
    tpu.vector_store %arg10[%c6, %c0_34], %58 {strides = array<i32>} : memref<16x8xf32, #tpu.memory_space<vmem>>, vector<1x8xf32>,
    %60 = vector.extract_strided_slice %0 {offsets = [0, 28], sizes = [8, 4], strides = [1, 1]} : vector<8x64xf32> to vector<8x4xf32>
    %cst_35 = arith.constant dense<0.000000e+00> : vector<32x8xf32>
    %61 = tpu.matmul %1, %60, %cst_35 {dimension_numbers = #tpu.dot_dimension_numbers<[1], [1], [0], [0], [0, 0, 1, 0], [], []>} : vector<32x4xf32>, vector<8x4xf32>, vector<32x8xf32> -> vector<32x8xf32>
    %62 = vector.broadcast %2 : vector<32x1xf32> to vector<32x8xf32>
    %63 = arith.addf %61, %62 : vector<32x8xf32>
    %cst_36 = arith.constant 0.000000e+00 : f32
    %64 = vector.broadcast %cst_36 : f32 to vector<32x8xf32>
    %65 = arith.maximumf %63, %64 : vector<32x8xf32>
    %cst_37 = arith.constant dense<0.000000e+00> : vector<1x8xf32>
    %66 = tpu.matmul %3, %65, %cst_37 {dimension_numbers = #tpu.dot_dimension_numbers<[1], [0], [0], [1], [0, 0, 1, 1], [], []>} : vector<1x32xf32>, vector<32x8xf32>, vector<1x8xf32> -> vector<1x8xf32>
    %c7 = arith.constant 7 : index
    %c0_38 = arith.constant 0 : index
    %67 = vector.load %arg10[%c7, %c0_38] : memref<16x8xf32, #tpu.memory_space<vmem>>, vector<1x8xf32>
    tpu.vector_store %arg10[%c7, %c0_38], %66 {strides = array<i32>} : memref<16x8xf32, #tpu.memory_space<vmem>>, vector<1x8xf32>,
    %68 = vector.extract_strided_slice %0 {offsets = [0, 32], sizes = [8, 4], strides = [1, 1]} : vector<8x64xf32> to vector<8x4xf32>
    %cst_39 = arith.constant dense<0.000000e+00> : vector<32x8xf32>
    %69 = tpu.matmul %1, %68, %cst_39 {dimension_numbers = #tpu.dot_dimension_numbers<[1], [1], [0], [0], [0, 0, 1, 0], [], []>} : vector<32x4xf32>, vector<8x4xf32>, vector<32x8xf32> -> vector<32x8xf32>
    %70 = vector.broadcast %2 : vector<32x1xf32> to vector<32x8xf32>
    %71 = arith.addf %69, %70 : vector<32x8xf32>
    %cst_40 = arith.constant 0.000000e+00 : f32
    %72 = vector.broadcast %cst_40 : f32 to vector<32x8xf32>
    %73 = arith.maximumf %71, %72 : vector<32x8xf32>
    %cst_41 = arith.constant dense<0.000000e+00> : vector<1x8xf32>
    %74 = tpu.matmul %3, %73, %cst_41 {dimension_numbers = #tpu.dot_dimension_numbers<[1], [0], [0], [1], [0, 0, 1, 1], [], []>} : vector<1x32xf32>, vector<32x8xf32>, vector<1x8xf32> -> vector<1x8xf32>
    %c8 = arith.constant 8 : index
    %c0_42 = arith.constant 0 : index
    %75 = vector.load %arg10[%c8, %c0_42] : memref<16x8xf32, #tpu.memory_space<vmem>>, vector<1x8xf32>
    tpu.vector_store %arg10[%c8, %c0_42], %74 {strides = array<i32>} : memref<16x8xf32, #tpu.memory_space<vmem>>, vector<1x8xf32>,
    %76 = vector.extract_strided_slice %0 {offsets = [0, 36], sizes = [8, 4], strides = [1, 1]} : vector<8x64xf32> to vector<8x4xf32>
    %cst_43 = arith.constant dense<0.000000e+00> : vector<32x8xf32>
    %77 = tpu.matmul %1, %76, %cst_43 {dimension_numbers = #tpu.dot_dimension_numbers<[1], [1], [0], [0], [0, 0, 1, 0], [], []>} : vector<32x4xf32>, vector<8x4xf32>, vector<32x8xf32> -> vector<32x8xf32>
    %78 = vector.broadcast %2 : vector<32x1xf32> to vector<32x8xf32>
    %79 = arith.addf %77, %78 : vector<32x8xf32>
    %cst_44 = arith.constant 0.000000e+00 : f32
    %80 = vector.broadcast %cst_44 : f32 to vector<32x8xf32>
    %81 = arith.maximumf %79, %80 : vector<32x8xf32>
    %cst_45 = arith.constant dense<0.000000e+00> : vector<1x8xf32>
    %82 = tpu.matmul %3, %81, %cst_45 {dimension_numbers = #tpu.dot_dimension_numbers<[1], [0], [0], [1], [0, 0, 1, 1], [], []>} : vector<1x32xf32>, vector<32x8xf32>, vector<1x8xf32> -> vector<1x8xf32>
    %c9 = arith.constant 9 : index
    %c0_46 = arith.constant 0 : index
    %83 = vector.load %arg10[%c9, %c0_46] : memref<16x8xf32, #tpu.memory_space<vmem>>, vector<1x8xf32>
    tpu.vector_store %arg10[%c9, %c0_46], %82 {strides = array<i32>} : memref<16x8xf32, #tpu.memory_space<vmem>>, vector<1x8xf32>,
    %84 = vector.extract_strided_slice %0 {offsets = [0, 40], sizes = [8, 4], strides = [1, 1]} : vector<8x64xf32> to vector<8x4xf32>
    %cst_47 = arith.constant dense<0.000000e+00> : vector<32x8xf32>
    %85 = tpu.matmul %1, %84, %cst_47 {dimension_numbers = #tpu.dot_dimension_numbers<[1], [1], [0], [0], [0, 0, 1, 0], [], []>} : vector<32x4xf32>, vector<8x4xf32>, vector<32x8xf32> -> vector<32x8xf32>
    %86 = vector.broadcast %2 : vector<32x1xf32> to vector<32x8xf32>
    %87 = arith.addf %85, %86 : vector<32x8xf32>
    %cst_48 = arith.constant 0.000000e+00 : f32
    %88 = vector.broadcast %cst_48 : f32 to vector<32x8xf32>
    %89 = arith.maximumf %87, %88 : vector<32x8xf32>
    %cst_49 = arith.constant dense<0.000000e+00> : vector<1x8xf32>
    %90 = tpu.matmul %3, %89, %cst_49 {dimension_numbers = #tpu.dot_dimension_numbers<[1], [0], [0], [1], [0, 0, 1, 1], [], []>} : vector<1x32xf32>, vector<32x8xf32>, vector<1x8xf32> -> vector<1x8xf32>
    %c10 = arith.constant 10 : index
    %c0_50 = arith.constant 0 : index
    %91 = vector.load %arg10[%c10, %c0_50] : memref<16x8xf32, #tpu.memory_space<vmem>>, vector<1x8xf32>
    tpu.vector_store %arg10[%c10, %c0_50], %90 {strides = array<i32>} : memref<16x8xf32, #tpu.memory_space<vmem>>, vector<1x8xf32>,
    %92 = vector.extract_strided_slice %0 {offsets = [0, 44], sizes = [8, 4], strides = [1, 1]} : vector<8x64xf32> to vector<8x4xf32>
    %cst_51 = arith.constant dense<0.000000e+00> : vector<32x8xf32>
    %93 = tpu.matmul %1, %92, %cst_51 {dimension_numbers = #tpu.dot_dimension_numbers<[1], [1], [0], [0], [0, 0, 1, 0], [], []>} : vector<32x4xf32>, vector<8x4xf32>, vector<32x8xf32> -> vector<32x8xf32>
    %94 = vector.broadcast %2 : vector<32x1xf32> to vector<32x8xf32>
    %95 = arith.addf %93, %94 : vector<32x8xf32>
    %cst_52 = arith.constant 0.000000e+00 : f32
    %96 = vector.broadcast %cst_52 : f32 to vector<32x8xf32>
    %97 = arith.maximumf %95, %96 : vector<32x8xf32>
    %cst_53 = arith.constant dense<0.000000e+00> : vector<1x8xf32>
    %98 = tpu.matmul %3, %97, %cst_53 {dimension_numbers = #tpu.dot_dimension_numbers<[1], [0], [0], [1], [0, 0, 1, 1], [], []>} : vector<1x32xf32>, vector<32x8xf32>, vector<1x8xf32> -> vector<1x8xf32>
    %c11 = arith.constant 11 : index
    %c0_54 = arith.constant 0 : index
    %99 = vector.load %arg10[%c11, %c0_54] : memref<16x8xf32, #tpu.memory_space<vmem>>, vector<1x8xf32>
    tpu.vector_store %arg10[%c11, %c0_54], %98 {strides = array<i32>} : memref<16x8xf32, #tpu.memory_space<vmem>>, vector<1x8xf32>,
    %100 = vector.extract_strided_slice %0 {offsets = [0, 48], sizes = [8, 4], strides = [1, 1]} : vector<8x64xf32> to vector<8x4xf32>
    %cst_55 = arith.constant dense<0.000000e+00> : vector<32x8xf32>
    %101 = tpu.matmul %1, %100, %cst_55 {dimension_numbers = #tpu.dot_dimension_numbers<[1], [1], [0], [0], [0, 0, 1, 0], [], []>} : vector<32x4xf32>, vector<8x4xf32>, vector<32x8xf32> -> vector<32x8xf32>
    %102 = vector.broadcast %2 : vector<32x1xf32> to vector<32x8xf32>
    %103 = arith.addf %101, %102 : vector<32x8xf32>
    %cst_56 = arith.constant 0.000000e+00 : f32
    %104 = vector.broadcast %cst_56 : f32 to vector<32x8xf32>
    %105 = arith.maximumf %103, %104 : vector<32x8xf32>
    %cst_57 = arith.constant dense<0.000000e+00> : vector<1x8xf32>
    %106 = tpu.matmul %3, %105, %cst_57 {dimension_numbers = #tpu.dot_dimension_numbers<[1], [0], [0], [1], [0, 0, 1, 1], [], []>} : vector<1x32xf32>, vector<32x8xf32>, vector<1x8xf32> -> vector<1x8xf32>
    %c12 = arith.constant 12 : index
    %c0_58 = arith.constant 0 : index
    %107 = vector.load %arg10[%c12, %c0_58] : memref<16x8xf32, #tpu.memory_space<vmem>>, vector<1x8xf32>
    tpu.vector_store %arg10[%c12, %c0_58], %106 {strides = array<i32>} : memref<16x8xf32, #tpu.memory_space<vmem>>, vector<1x8xf32>,
    %108 = vector.extract_strided_slice %0 {offsets = [0, 52], sizes = [8, 4], strides = [1, 1]} : vector<8x64xf32> to vector<8x4xf32>
    %cst_59 = arith.constant dense<0.000000e+00> : vector<32x8xf32>
    %109 = tpu.matmul %1, %108, %cst_59 {dimension_numbers = #tpu.dot_dimension_numbers<[1], [1], [0], [0], [0, 0, 1, 0], [], []>} : vector<32x4xf32>, vector<8x4xf32>, vector<32x8xf32> -> vector<32x8xf32>
    %110 = vector.broadcast %2 : vector<32x1xf32> to vector<32x8xf32>
    %111 = arith.addf %109, %110 : vector<32x8xf32>
    %cst_60 = arith.constant 0.000000e+00 : f32
    %112 = vector.broadcast %cst_60 : f32 to vector<32x8xf32>
    %113 = arith.maximumf %111, %112 : vector<32x8xf32>
    %cst_61 = arith.constant dense<0.000000e+00> : vector<1x8xf32>
    %114 = tpu.matmul %3, %113, %cst_61 {dimension_numbers = #tpu.dot_dimension_numbers<[1], [0], [0], [1], [0, 0, 1, 1], [], []>} : vector<1x32xf32>, vector<32x8xf32>, vector<1x8xf32> -> vector<1x8xf32>
    %c13 = arith.constant 13 : index
    %c0_62 = arith.constant 0 : index
    %115 = vector.load %arg10[%c13, %c0_62] : memref<16x8xf32, #tpu.memory_space<vmem>>, vector<1x8xf32>
    tpu.vector_store %arg10[%c13, %c0_62], %114 {strides = array<i32>} : memref<16x8xf32, #tpu.memory_space<vmem>>, vector<1x8xf32>,
    %116 = vector.extract_strided_slice %0 {offsets = [0, 56], sizes = [8, 4], strides = [1, 1]} : vector<8x64xf32> to vector<8x4xf32>
    %cst_63 = arith.constant dense<0.000000e+00> : vector<32x8xf32>
    %117 = tpu.matmul %1, %116, %cst_63 {dimension_numbers = #tpu.dot_dimension_numbers<[1], [1], [0], [0], [0, 0, 1, 0], [], []>} : vector<32x4xf32>, vector<8x4xf32>, vector<32x8xf32> -> vector<32x8xf32>
    %118 = vector.broadcast %2 : vector<32x1xf32> to vector<32x8xf32>
    %119 = arith.addf %117, %118 : vector<32x8xf32>
    %cst_64 = arith.constant 0.000000e+00 : f32
    %120 = vector.broadcast %cst_64 : f32 to vector<32x8xf32>
    %121 = arith.maximumf %119, %120 : vector<32x8xf32>
    %cst_65 = arith.constant dense<0.000000e+00> : vector<1x8xf32>
    %122 = tpu.matmul %3, %121, %cst_65 {dimension_numbers = #tpu.dot_dimension_numbers<[1], [0], [0], [1], [0, 0, 1, 1], [], []>} : vector<1x32xf32>, vector<32x8xf32>, vector<1x8xf32> -> vector<1x8xf32>
    %c14 = arith.constant 14 : index
    %c0_66 = arith.constant 0 : index
    %123 = vector.load %arg10[%c14, %c0_66] : memref<16x8xf32, #tpu.memory_space<vmem>>, vector<1x8xf32>
    tpu.vector_store %arg10[%c14, %c0_66], %122 {strides = array<i32>} : memref<16x8xf32, #tpu.memory_space<vmem>>, vector<1x8xf32>,
    %124 = vector.extract_strided_slice %0 {offsets = [0, 60], sizes = [8, 4], strides = [1, 1]} : vector<8x64xf32> to vector<8x4xf32>
    %cst_67 = arith.constant dense<0.000000e+00> : vector<32x8xf32>
    %125 = tpu.matmul %1, %124, %cst_67 {dimension_numbers = #tpu.dot_dimension_numbers<[1], [1], [0], [0], [0, 0, 1, 0], [], []>} : vector<32x4xf32>, vector<8x4xf32>, vector<32x8xf32> -> vector<32x8xf32>
    %126 = vector.broadcast %2 : vector<32x1xf32> to vector<32x8xf32>
    %127 = arith.addf %125, %126 : vector<32x8xf32>
    %cst_68 = arith.constant 0.000000e+00 : f32
    %128 = vector.broadcast %cst_68 : f32 to vector<32x8xf32>
    %129 = arith.maximumf %127, %128 : vector<32x8xf32>
    %cst_69 = arith.constant dense<0.000000e+00> : vector<1x8xf32>
    %130 = tpu.matmul %3, %129, %cst_69 {dimension_numbers = #tpu.dot_dimension_numbers<[1], [0], [0], [1], [0, 0, 1, 1], [], []>} : vector<1x32xf32>, vector<32x8xf32>, vector<1x8xf32> -> vector<1x8xf32>
    %c15 = arith.constant 15 : index
    %c0_70 = arith.constant 0 : index
    %131 = vector.load %arg10[%c15, %c0_70] : memref<16x8xf32, #tpu.memory_space<vmem>>, vector<1x8xf32>
    tpu.vector_store %arg10[%c15, %c0_70], %130 {strides = array<i32>} : memref<16x8xf32, #tpu.memory_space<vmem>>, vector<1x8xf32>,
    %c0_71 = arith.constant 0 : index
    %c0_72 = arith.constant 0 : index
    %132 = vector.load %arg5[%c0_71, %c0_72] : memref<32x16xf32, #tpu.memory_space<vmem>>, vector<32x16xf32>
    %c0_73 = arith.constant 0 : index
    %c0_74 = arith.constant 0 : index
    %133 = vector.load %arg10[%c0_73, %c0_74] : memref<16x8xf32, #tpu.memory_space<vmem>>, vector<16x8xf32>
    %cst_75 = arith.constant dense<0.000000e+00> : vector<32x8xf32>
    %134 = tpu.matmul %132, %133, %cst_75 {dimension_numbers = #tpu.dot_dimension_numbers<[1], [0], [0], [1], [0, 0, 1, 1], [], []>} : vector<32x16xf32>, vector<16x8xf32>, vector<32x8xf32> -> vector<32x8xf32>
    %c0_76 = arith.constant 0 : index
    %c0_77 = arith.constant 0 : index
    %135 = vector.load %arg6[%c0_76, %c0_77] : memref<32x1xf32, #tpu.memory_space<vmem>>, vector<32x1xf32>
    %136 = vector.broadcast %135 : vector<32x1xf32> to vector<32x8xf32>
    %137 = arith.addf %134, %136 : vector<32x8xf32>
    %cst_78 = arith.constant 0.000000e+00 : f32
    %138 = vector.broadcast %cst_78 : f32 to vector<32x8xf32>
    %139 = arith.maximumf %137, %138 : vector<32x8xf32>
    %c0_79 = arith.constant 0 : index
    %c0_80 = arith.constant 0 : index
    %140 = vector.load %arg7[%c0_79, %c0_80] : memref<1x32xf32, #tpu.memory_space<vmem>>, vector<1x32xf32>
    %cst_81 = arith.constant dense<0.000000e+00> : vector<1x8xf32>
    %141 = tpu.matmul %140, %139, %cst_81 {dimension_numbers = #tpu.dot_dimension_numbers<[1], [0], [0], [1], [0, 0, 1, 1], [], []>} : vector<1x32xf32>, vector<32x8xf32>, vector<1x8xf32> -> vector<1x8xf32>
    %c0_82 = arith.constant 0 : index
    %c0_83 = arith.constant 0 : index
    %142 = memref.load %arg8[%c0_82, %c0_83] : memref<1x1xf32, #tpu.memory_space<smem>>
    %143 = vector.broadcast %142 : f32 to vector<1x8xf32>
    %144 = arith.addf %141, %143 : vector<1x8xf32>
    %c0_84 = arith.constant 0 : index
    %c0_85 = arith.constant 0 : index
    %145 = vector.load %arg9[%c0_84, %c0_85] : memref<1x8xf32, #tpu.memory_space<vmem>>, vector<1x8xf32>
    tpu.vector_store %arg9[%c0_84, %c0_85], %144 {strides = array<i32>} : memref<1x8xf32, #tpu.memory_space<vmem>>, vector<1x8xf32>,
    return
  }
  func.func @transform_0(%arg0: i32) -> (i32, i32) {
    %c0_i32 = arith.constant 0 : i32
    %c0_i32_0 = arith.constant 0 : i32
    return %arg0, %c0_i32 : i32, i32
  }
  func.func @transform_1(%arg0: i32) -> (i32, i32) {
    %c0_i32 = arith.constant 0 : i32
    %c0_i32_0 = arith.constant 0 : i32
    %c0_i32_1 = arith.constant 0 : i32
    return %c0_i32, %c0_i32_0 : i32, i32
  }
  func.func @transform_2(%arg0: i32) -> (i32, i32) {
    %c0_i32 = arith.constant 0 : i32
    %c0_i32_0 = arith.constant 0 : i32
    %c0_i32_1 = arith.constant 0 : i32
    return %c0_i32, %c0_i32_0 : i32, i32
  }
  func.func @transform_3(%arg0: i32) -> (i32, i32) {
    %c0_i32 = arith.constant 0 : i32
    %c0_i32_0 = arith.constant 0 : i32
    %c0_i32_1 = arith.constant 0 : i32
    return %c0_i32, %c0_i32_0 : i32, i32
  }
  func.func @transform_4(%arg0: i32) -> (i32, i32) {
    %c0_i32 = arith.constant 0 : i32
    %c0_i32_0 = arith.constant 0 : i32
    %c0_i32_1 = arith.constant 0 : i32
    return %c0_i32, %c0_i32_0 : i32, i32
  }
  func.func @transform_5(%arg0: i32) -> (i32, i32) {
    %c0_i32 = arith.constant 0 : i32
    %c0_i32_0 = arith.constant 0 : i32
    %c0_i32_1 = arith.constant 0 : i32
    return %c0_i32, %c0_i32_0 : i32, i32
  }
  func.func @transform_6(%arg0: i32) -> (i32, i32) {
    %c0_i32 = arith.constant 0 : i32
    %c0_i32_0 = arith.constant 0 : i32
    %c0_i32_1 = arith.constant 0 : i32
    return %c0_i32, %c0_i32_0 : i32, i32
  }
  func.func @transform_7(%arg0: i32) -> (i32, i32) {
    %c0_i32 = arith.constant 0 : i32
    %c0_i32_0 = arith.constant 0 : i32
    %c0_i32_1 = arith.constant 0 : i32
    return %c0_i32, %c0_i32_0 : i32, i32
  }
  func.func @transform_8(%arg0: i32) -> (i32, i32) {
    %c0_i32 = arith.constant 0 : i32
    %c0_i32_0 = arith.constant 0 : i32
    return %c0_i32, %arg0 : i32, i32
  }
}

</mosaic_0001>

<bundles_post_ra>
// kernel: sdnet_forward.1
= control target key start
LH: loop header
LB: loop body
LE: loop exit
PB: predicated region body
PF: predicated region fallthrough
CT: control target
= control target key end

     0   :  { %vm61_vm0 = vcmask 31744   ;;  %s3674_s9 = smov 124   ;;  %s4175_s0 = inlined_call_operand.vmem [shape: f32[8,64], index: 0, kind: input, shape index: {}]   ;;  %s4176_s1 = inlined_call_operand.vmem [shape: f32[32,4], index: 1, kind: input, shape index: {}]   ;;  %s4177_s2 = inlined_call_operand.vmem [shape: f32[32,1], index: 2, kind: input, shape index: {}]   ;;  %s4178_s3 = inlined_call_operand.vmem [shape: f32[1,32], index: 3, kind: input, shape index: {}]   ;;  %s4179_s4 = inlined_call_operand.vmem [shape: f32[32,16], index: 4, kind: input, shape index: {}]   ;;  %s4180_s5 = inlined_call_operand.vmem [shape: f32[32,1], index: 5, kind: input, shape index: {}]   ;;  %s4181_s6 = inlined_call_operand.vmem [shape: f32[1,32], index: 6, kind: input, shape index: {}]   ;;  %s4182_s7 = inlined_call_operand.<no memory space> [shape: f32[1,1], index: 7, kind: input, shape index: {}]   ;;  %s4183_s8 = inlined_call_operand.hbm [shape: f32[1,8], index: 8, kind: output, shape index: {}]  }
   0x1   :  { %v31_v0 = vld [vmem:[%s4175_s0] sm:$0xff] }
   0x2   :  { %v3745_v1 = vld [vmem:[%s4176_s1] sm:$0xff]  ;;  %242 = vrot.lane.b32.xlu0 %v31_v0, %s3674_s9  ;;  %3197 = vmatprep.subr.msk.mxu0 %vm61_vm0, %v31_v0 }
   0x3   :  { %14 = vsyncpa [#allocation5], 0  ;;  %s3675_s10 = smov 116   ;;  %3198 = vmatpush3.xpose.msk.msra.mxu0 %vm61_vm0, %v31_v0  ;;  %v3752_v2 = vld [vmem:[%s4176_s1 + $0x8] sm:$0xff]  ;;  %3199 = vmatprep.mubr.msk.f32.mxu0 %vm61_vm0, %v3745_v1  ;;  %v3759_v3 = vld [vmem:[%s4176_s1 + $0x10] sm:$0xff]  ;;  %s3676_s14 = smov 120  }
   0x4   :  { %570 = vrot.lane.b32.xlu1 %v31_v0, %s3675_s10  ;;  %s3677_s15 = smov 112   ;;  %v3768_v4 = vld [vmem:[%s4176_s1 + $0x18] sm:$0xff]  ;;  %s3678_s18 = smov 108   ;;  %v3689_v5 = vmov 0   ;;  %v36_v6 = vld [vmem:[%s4177_s2] sm:$0xff]  ;;  %v38_v7 = vld [vmem:[%s4177_s2 + $0x10] sm:$0xff] }
   0x5   :  { %s3679_s19 = smov 104   ;;  %s3680_s20 = smov 100   ;;  %3648 = vset.pattern.permute.xlu1 %v3689_v5  ;;  %3649 = vset.pattern.permute.xlu0 %v3689_v5  ;;  %v39_v8 = vld [vmem:[%s4177_s2 + $0x18] sm:$0xff]  ;;  %v2709_v9 = vld [vmem:[%s4180_s5 + $0x8] sm:$0xff]  ;;  %v2708_v12 = vld [vmem:[%s4180_s5] sm:$0xff]  ;;  %v3690_v14 = vmov 0.0|0.0  }
   0x6   :  { %406 = vrot.lane.b32.xlu0 %v31_v0, %s3676_s14  ;;  %3200 = vmatmul.mubr.msk.f32.vlgmr.msra.gmra.mrb[0].mxu0 %vm61_vm0, %v3752_v2  ;;  %s3681_s21 = smov 96   ;;  %s3682_s22 = smov 92   ;;  %v37_v10 = vld [vmem:[%s4177_s2 + $0x8] sm:$0xff]  ;;  %v2711_v11 = vld [vmem:[%s4180_s5 + $0x18] sm:$0xff]  ;;  %v2710_v13 = vld [vmem:[%s4180_s5 + $0x10] sm:$0xff]  ;;  %vm3691_vm1 = vmmov 0  }
   0x7   :  { %3202 = vmatprep.mubr.msk.f32.mxu0 %vm61_vm0, %v3759_v3  ;;  %s3683_s23 = smov 88   ;;  %s3684_s1 = smov 84   ;;  %3522 = vmatprep.subr.bf16.mxu1 %v3690_v14  ;;  %v3692_v31 = vmov 0.0   ;;  %v3957_v49 = vld [vmem:[%s4178_s3] sm:$0x1]  ;;  %vm166_vm2 = vcmask 261120  }
   0x8   :  { %734 = vrot.lane.b32.xlu1 %v31_v0, %s3677_s15  ;;  %s3685_s24 = smov 80   ;;  %s3686_s25 = smov 76   ;;  %3213 = vmatprep.mubr.msk.f32.mxu1 %vm3691_vm1, %v3692_v31  ;;  %vm240_vm3 = vcmask 57344   ;;  %vm2732_vm4 = vcmask 130048  }
   0x9   :  { %s3687_s26 = smov 72   ;;  %s3688_s27 = smov 68  }
   0xa   :  { %898 = vrot.lane.b32.xlu0 %v31_v0, %s3678_s18  ;;  %3203 = vmatmul.mubr.msk.f32.gmra.mrb[2].mxu0 %vm61_vm0, %v3768_v4  ;;  %s3693_s30 = smov [#allocation4]  }
   0xb   :  { %3218 = vmatprep.mubr.msk.f32.mxu0 %vm61_vm0, %v3745_v1  ;;  %s2917_s9 = sshll.u32 %s3693_s30, 4  ;;  %s2918_s9 = int_to_ptr.vmem [resolvable:$true] %s2917_s9 }
   0xc   :  { %1062 = vrot.lane.b32.xlu1 %v31_v0, %s3679_s19  ;;  %s3650_s10 = scalar_lea.vmem %s2918_s9, 16  ;;  %s3654_s11 = scalar_lea.vmem %s2918_s9, 32 }
   0xd   :  { %p3651_p0 = scmp.ne.s32.totalorder %s2918_s9, %s3650_s10  ;;  %p3655_p1 = scmp.lt.s32.totalorder %s2918_s9, %s2918_s9 }
   0xe   :  { %1226 = vrot.lane.b32.xlu0 %v31_v0, %s3680_s20  ;;  %p3656_p2 = scmp.lt.s32.totalorder %s3654_s11, %s3650_s10 }
  0x10   :  { %1390 = vrot.lane.b32.xlu1 %v31_v0, %s3681_s21  ;;  %p3657_p3 = por %p3656_p2, %p3655_p1 }
  0x12   :  { %1554 = vrot.lane.b32.xlu0 %v31_v0, %s3682_s22  ;;  %p3658_p4 = pnand %p3657_p3, %p3651_p0 }
  0x14   :  { %1718 = vrot.lane.b32.xlu1 %v31_v0, %s3683_s23 }
  0x16   :  { %1882 = vrot.lane.b32.xlu0 %v31_v0, %s3684_s1 }
  0x18   :  { %2046 = vrot.lane.b32.xlu1 %v31_v0, %s3685_s24 }
  0x1a   :  { %2210 = vrot.lane.b32.xlu0 %v31_v0, %s3686_s25 }
  0x1c   :  { %2374 = vrot.lane.b32.xlu1 %v31_v0, %s3687_s26 }
  0x1e   :  { %2538 = vrot.lane.b32.xlu0 %v31_v0, %s3688_s27 }
  0x20   :  { %43 = vperm.xlu1 %3648, %v36_v6  }
  0x22   :  { %48 = vperm.xlu0 %3649, %v37_v10  }
  0x24   :  { %53 = vperm.xlu1 %3648, %v38_v7  }
  0x26   :  { %2714 = vperm.xlu0 %3649, %v2708_v12  }
  0x28   :  { %58 = vperm.xlu1 %3648, %v39_v8  }
  0x2a   :  { %2724 = vperm.xlu0 %3649, %v2710_v13  }
  0x2c   :  { %2719 = vperm.xlu1 %3648, %v2709_v9  }
  0x30   :  { %2729 = vperm.xlu1 %3648, %v2711_v11  }
  0x74   :  { %v243_v15 = vpop.permute.xlu0 %242 }
  0x75   :  { %3216 = vmatprep.subr.msk.mxu0 %vm61_vm0, %v243_v15 }
  0x76   :  { %3217 = vmatpush3.xpose.msk.msra.mxu0 %vm61_vm0, %v243_v15  ;;  %v571_v17 = vpop.permute.xlu1 %570 }
  0x78   :  { %v407_v16 = vpop.permute.xlu0 %406 }
  0x79   :  { %3219 = vmatmul.mubr.msk.f32.vlgmr.msra.gmra.mrb[4].mxu0 %vm61_vm0, %v3752_v2  ;;  %3235 = vmatprep.subr.msk.mxu0 %vm61_vm0, %v407_v16 }
  0x7a   :  { %3221 = vmatprep.mubr.msk.f32.mxu0 %vm61_vm0, %v3759_v3  ;;  %3236 = vmatpush3.xpose.msk.msra.mxu0 %vm61_vm0, %v407_v16  ;;  %v735_v18 = vpop.permute.xlu1 %734 }
  0x7b   :  { %3254 = vmatprep.subr.msk.mxu0 %vm61_vm0, %v571_v17 }
  0x7c   :  { %v899_v19 = vpop.permute.xlu0 %898 }
  0x7d   :  { %3222 = vmatmul.mubr.msk.f32.gmra.mrb[6].mxu0 %vm61_vm0, %v3768_v4 }
  0x7e   :  { %3237 = vmatprep.mubr.msk.f32.mxu0 %vm61_vm0, %v3745_v1  ;;  %v1063_v20 = vpop.permute.xlu1 %1062 }
  0x80   :  { %v1227_v21 = vpop.permute.xlu0 %1226 }
  0x81   :  { %3238 = vmatmul.mubr.msk.f32.vlgmr.msra.gmra.mrb[8].mxu0 %vm61_vm0, %v3752_v2 }
  0x82   :  { %3240 = vmatprep.mubr.msk.f32.mxu0 %vm61_vm0, %v3759_v3  ;;  %3255 = vmatpush3.xpose.msk.msra.mxu0 %vm61_vm0, %v571_v17  ;;  %v1391_v22 = vpop.permute.xlu1 %1390 }
  0x83   :  { %3273 = vmatprep.subr.msk.mxu0 %vm61_vm0, %v735_v18 }
  0x84   :  { %v1555_v23 = vpop.permute.xlu0 %1554 }
  0x85   :  { %3241 = vmatmul.mubr.msk.f32.gmra.mrb[10].mxu0 %vm61_vm0, %v3768_v4 }
  0x86   :  { %3256 = vmatprep.mubr.msk.f32.mxu0 %vm61_vm0, %v3745_v1  ;;  %v1719_v24 = vpop.permute.xlu1 %1718 }
  0x88   :  { %v1883_v25 = vpop.permute.xlu0 %1882 }
  0x89   :  { %3257 = vmatmul.mubr.msk.f32.vlgmr.msra.gmra.mrb[12].mxu0 %vm61_vm0, %v3752_v2 }
  0x8a   :  { %3259 = vmatprep.mubr.msk.f32.mxu0 %vm61_vm0, %v3759_v3  ;;  %3274 = vmatpush3.xpose.msk.msra.mxu0 %vm61_vm0, %v735_v18  ;;  %v2047_v26 = vpop.permute.xlu1 %2046 }
  0x8b   :  { %3292 = vmatprep.subr.msk.mxu0 %vm61_vm0, %v899_v19 }
  0x8c   :  { %v2211_v27 = vpop.permute.xlu0 %2210 }
  0x8d   :  { %3260 = vmatmul.mubr.msk.f32.gmra.mrb[14].mxu0 %vm61_vm0, %v3768_v4 }
  0x8e   :  { %3275 = vmatprep.mubr.msk.f32.mxu0 %vm61_vm0, %v3745_v1  ;;  %v2375_v28 = vpop.permute.xlu1 %2374 }
  0x90   :  { %v2539_v30 = vpop.permute.xlu0 %2538 }
  0x91   :  { %3276 = vmatmul.mubr.msk.f32.vlgmr.msra.gmra.mrb[16].mxu0 %vm61_vm0, %v3752_v2 }
  0x92   :  { %3278 = vmatprep.mubr.msk.f32.mxu0 %vm61_vm0, %v3759_v3  ;;  %3293 = vmatpush3.xpose.msk.msra.mxu0 %vm61_vm0, %v899_v19 }
  0x93   :  { %3311 = vmatprep.subr.msk.mxu0 %vm61_vm0, %v1063_v20 }
  0x95   :  { %3279 = vmatmul.mubr.msk.f32.gmra.mrb[18].mxu0 %vm61_vm0, %v3768_v4 }
  0x96   :  { %3294 = vmatprep.mubr.msk.f32.mxu0 %vm61_vm0, %v3745_v1 }
  0x99   :  { %3295 = vmatmul.mubr.msk.f32.vlgmr.msra.gmra.mrb[20].mxu0 %vm61_vm0, %v3752_v2 }
  0x9a   :  { %3297 = vmatprep.mubr.msk.f32.mxu0 %vm61_vm0, %v3759_v3  ;;  %3312 = vmatpush3.xpose.msk.msra.mxu0 %vm61_vm0, %v1063_v20 }
  0x9b   :  { %3330 = vmatprep.subr.msk.mxu0 %vm61_vm0, %v1227_v21 }
  0x9d   :  { %3298 = vmatmul.mubr.msk.f32.gmra.mrb[22].mxu0 %vm61_vm0, %v3768_v4 }
  0x9e   :  { %3313 = vmatprep.mubr.msk.f32.mxu0 %vm61_vm0, %v3745_v1 }
  0x9f   :  { %v3914_v29 = vpop.permute.xlu1 %43 }
  0xa1   :  { %3314 = vmatmul.mubr.msk.f32.vlgmr.msra.gmra.mrb[24].mxu0 %vm61_vm0, %v3752_v2  ;;  %v3928_v33 = vpop.permute.xlu0 %48 }
  0xa2   :  { %3316 = vmatprep.mubr.msk.f32.mxu0 %vm61_vm0, %v3759_v3  ;;  %3331 = vmatpush3.xpose.msk.msra.mxu0 %vm61_vm0, %v1227_v21 }
  0xa3   :  { %3349 = vmatprep.subr.msk.mxu0 %vm61_vm0, %v1391_v22  ;;  %v3926_v32 = vpop.permute.xlu1 %53 }
  0xa5   :  { %3317 = vmatmul.mubr.msk.f32.gmra.mrb[26].mxu0 %vm61_vm0, %v3768_v4 }
  0xa6   :  { %3332 = vmatprep.mubr.msk.f32.mxu0 %vm61_vm0, %v3745_v1 }
  0xa7   :  { %v3940_v39 = vpop.permute.xlu1 %58 }
  0xa9   :  { %3333 = vmatmul.mubr.msk.f32.vlgmr.msra.gmra.mrb[28].mxu0 %vm61_vm0, %v3752_v2 }
  0xaa   :  { %3335 = vmatprep.mubr.msk.f32.mxu0 %vm61_vm0, %v3759_v3  ;;  %3350 = vmatpush3.xpose.msk.msra.mxu0 %vm61_vm0, %v1391_v22 }
  0xab   :  { %3368 = vmatprep.subr.msk.mxu0 %vm61_vm0, %v1555_v23 }
  0xad   :  { %3336 = vmatmul.mubr.msk.f32.gmra.mrb[30].mxu0 %vm61_vm0, %v3768_v4 }
  0xae   :  { %3351 = vmatprep.mubr.msk.f32.mxu0 %vm61_vm0, %v3745_v1 }
  0xb1   :  { %3352 = vmatmul.mubr.msk.f32.vlgmr.msra.gmra.mrb[32].mxu0 %vm61_vm0, %v3752_v2 }
  0xb2   :  { %3354 = vmatprep.mubr.msk.f32.mxu0 %vm61_vm0, %v3759_v3  ;;  %3369 = vmatpush3.xpose.msk.msra.mxu0 %vm61_vm0, %v1555_v23 }
  0xb3   :  { %3387 = vmatprep.subr.msk.mxu0 %vm61_vm0, %v1719_v24 }
  0xb5   :  { %3355 = vmatmul.mubr.msk.f32.gmra.mrb[34].mxu0 %vm61_vm0, %v3768_v4 }
  0xb6   :  { %3370 = vmatprep.mubr.msk.f32.mxu0 %vm61_vm0, %v3745_v1 }
  0xb9   :  { %3371 = vmatmul.mubr.msk.f32.vlgmr.msra.gmra.mrb[36].mxu0 %vm61_vm0, %v3752_v2 }
  0xba   :  { %3373 = vmatprep.mubr.msk.f32.mxu0 %vm61_vm0, %v3759_v3  ;;  %3388 = vmatpush3.xpose.msk.msra.mxu0 %vm61_vm0, %v1719_v24 }
  0xbb   :  { %3406 = vmatprep.subr.msk.mxu0 %vm61_vm0, %v1883_v25 }
  0xbd   :  { %3374 = vmatmul.mubr.msk.f32.gmra.mrb[38].mxu0 %vm61_vm0, %v3768_v4 }
  0xbe   :  { %3389 = vmatprep.mubr.msk.f32.mxu0 %vm61_vm0, %v3745_v1 }
  0xc1   :  { %3390 = vmatmul.mubr.msk.f32.vlgmr.msra.gmra.mrb[40].mxu0 %vm61_vm0, %v3752_v2 }
  0xc2   :  { %3392 = vmatprep.mubr.msk.f32.mxu0 %vm61_vm0, %v3759_v3  ;;  %3407 = vmatpush3.xpose.msk.msra.mxu0 %vm61_vm0, %v1883_v25 }
  0xc3   :  { %3425 = vmatprep.subr.msk.mxu0 %vm61_vm0, %v2047_v26 }
  0xc5   :  { %3393 = vmatmul.mubr.msk.f32.gmra.mrb[42].mxu0 %vm61_vm0, %v3768_v4 }
  0xc6   :  { %3408 = vmatprep.mubr.msk.f32.mxu0 %vm61_vm0, %v3745_v1 }
  0xc9   :  { %3409 = vmatmul.mubr.msk.f32.vlgmr.msra.gmra.mrb[44].mxu0 %vm61_vm0, %v3752_v2 }
  0xca   :  { %3411 = vmatprep.mubr.msk.f32.mxu0 %vm61_vm0, %v3759_v3  ;;  %3426 = vmatpush3.xpose.msk.msra.mxu0 %vm61_vm0, %v2047_v26 }
  0xcb   :  { %3444 = vmatprep.subr.msk.mxu0 %vm61_vm0, %v2211_v27 }
  0xcd   :  { %3412 = vmatmul.mubr.msk.f32.gmra.mrb[46].mxu0 %vm61_vm0, %v3768_v4 }
  0xce   :  { %3427 = vmatprep.mubr.msk.f32.mxu0 %vm61_vm0, %v3745_v1 }
  0xd1   :  { %3428 = vmatmul.mubr.msk.f32.vlgmr.msra.gmra.mrb[48].mxu0 %vm61_vm0, %v3752_v2 }
  0xd2   :  { %3430 = vmatprep.mubr.msk.f32.mxu0 %vm61_vm0, %v3759_v3  ;;  %3445 = vmatpush3.xpose.msk.msra.mxu0 %vm61_vm0, %v2211_v27 }
  0xd3   :  { %3463 = vmatprep.subr.msk.mxu0 %vm61_vm0, %v2375_v28 }
  0xd5   :  { %3431 = vmatmul.mubr.msk.f32.gmra.mrb[50].mxu0 %vm61_vm0, %v3768_v4 }
  0xd6   :  { %3446 = vmatprep.mubr.msk.f32.mxu0 %vm61_vm0, %v3745_v1 }
  0xd9   :  { %3447 = vmatmul.mubr.msk.f32.vlgmr.msra.gmra.mrb[52].mxu0 %vm61_vm0, %v3752_v2  ;;  %v3201_v34 = vpop.f32.mrb[0].mxu0 }
  0xda   :  { %3449 = vmatprep.mubr.msk.f32.mxu0 %vm61_vm0, %v3759_v3  ;;  %3464 = vmatpush3.xpose.msk.msra.mxu0 %vm61_vm0, %v2375_v28  ;;  %v143_v35 = vpop.f32.mrb[1].mxu0  ;;  %v149_v36 = vadd.f32 %v3201_v34, %v3928_v33 }
  0xdb   :  { %3482 = vmatprep.subr.msk.mxu0 %vm61_vm0, %v2539_v30  ;;  %v144_v37 = vadd.f32 %v143_v35, %v3914_v29 }
  0xdc   :  { %v163_v38 = vmax.f32 %v149_v36, 0.0 }
  0xdd   :  { %3450 = vmatmul.mubr.msk.f32.gmra.mrb[54].mxu0 %vm61_vm0, %v3768_v4  ;;  %v162_v40 = vmax.f32 %v144_v37, 0.0  ;;  %v3204_v41 = vpop.f32.mrb[2].mxu0 }
  0xde   :  { %3465 = vmatprep.mubr.msk.f32.mxu0 %vm61_vm0, %v3745_v1  ;;  %v159_v42 = vadd.f32 %v3204_v41, %v3940_v39  ;;  %v153_v43 = vpop.f32.mrb[3].mxu0 }
  0xdf   :  { %v154_v44 = vadd.f32 %v153_v43, %v3926_v32  ;;  %v3523_v45 = vpack.c.bf16 %v163_v38, %v162_v40 }
  0xe0   :  { %v165_v46 = vmax.f32 %v159_v42, 0.0 }
  0xe1   :  { %3466 = vmatmul.mubr.msk.f32.vlgmr.msra.gmra.mrb[56].mxu0 %vm61_vm0, %v3752_v2  ;;  %v164_v47 = vmax.f32 %v154_v44, 0.0  ;;  %3524 = vmatpush3.bf16.msra.mxu1 %v3523_v45 }
  0xe2   :  { %3468 = vmatprep.mubr.msk.f32.mxu0 %vm61_vm0, %v3759_v3  ;;  %3483 = vmatpush3.xpose.msk.msra.mxu0 %vm61_vm0, %v2539_v30 }
  0xe3   :  { %v3526_v48 = vpack.c.bf16 %v165_v46, %v164_v47  ;;  %3525 = vmatprep.subr.bf16.mxu1 %v3690_v14 }
  0xe5   :  { %3469 = vmatmul.mubr.msk.f32.gmra.mrb[58].mxu0 %vm61_vm0, %v3768_v4  ;;  %3527 = vmatpush3.bf16.msra.mxu1 %v3526_v48 }
  0xe6   :  { %3484 = vmatprep.mubr.msk.f32.mxu0 %vm61_vm0, %v3745_v1  ;;  %3528 = vmatprep.subr.bf16.mxu1 %v3690_v14 }
  0xe8   :  { %3214 = vmatmul.mubr.msk.f32.vlgmr.msra.gmra.mrb[0].mxu1 %vm166_vm2, %v3957_v49 }
  0xe9   :  { %3485 = vmatmul.mubr.msk.f32.vlgmr.msra.gmra.mrb[60].mxu0 %vm61_vm0, %v3752_v2  ;;  %3232 = vmatprep.mubr.msk.f32.mxu1 %vm3691_vm1, %v3692_v31 }
  0xea   :  { %3487 = vmatprep.mubr.msk.f32.mxu0 %vm61_vm0, %v3759_v3 }
  0xed   :  { %3488 = vmatmul.mubr.msk.f32.gmra.mrb[62].mxu0 %vm61_vm0, %v3768_v4 }
 0x14c   :  { %v3220_v50 = vpop.f32.mrb[4].mxu0 }
 0x14d   :  { %v318_v51 = vadd.f32 %v3220_v50, %v3928_v33  ;;  %v312_v52 = vpop.f32.mrb[5].mxu0 }
 0x14e   :  { %v313_v53 = vadd.f32 %v312_v52, %v3914_v29 }
 0x14f   :  { %v332_v54 = vmax.f32 %v318_v51, 0.0 }
 0x150   :  { %v331_v55 = vmax.f32 %v313_v53, 0.0  ;;  %v3223_v56 = vpop.f32.mrb[6].mxu0 }
 0x151   :  { %v328_v57 = vadd.f32 %v3223_v56, %v3940_v39  ;;  %v322_v58 = vpop.f32.mrb[7].mxu0 }
 0x152   :  { %v3529_v59 = vpack.c.bf16 %v332_v54, %v331_v55  ;;  %v323_v60 = vadd.f32 %v322_v58, %v3926_v32 }
 0x153   :  { %v334_v61 = vmax.f32 %v328_v57, 0.0 }
 0x154   :  { %v333_v62 = vmax.f32 %v323_v60, 0.0  ;;  %3530 = vmatpush3.bf16.msra.mxu1 %v3529_v59  ;;  %v3239_v63 = vpop.f32.mrb[8].mxu0 }
 0x155   :  { %v482_v0 = vadd.f32 %v3239_v63, %v3928_v33  ;;  %v476_v1 = vpop.f32.mrb[9].mxu0  ;;  %3531 = vmatprep.subr.bf16.mxu1 %v3690_v14 }
 0x156   :  { %v3532_v2 = vpack.c.bf16 %v334_v61, %v333_v62  ;;  %v477_v3 = vadd.f32 %v476_v1, %v3914_v29 }
 0x157   :  { %v496_v4 = vmax.f32 %v482_v0, 0.0 }
 0x158   :  { %v495_v5 = vmax.f32 %v477_v3, 0.0  ;;  %3533 = vmatpush3.bf16.msra.mxu1 %v3532_v2  ;;  %v3242_v6 = vpop.f32.mrb[10].mxu0 }
 0x159   :  { %v492_v7 = vadd.f32 %v3242_v6, %v3940_v39  ;;  %v486_v8 = vpop.f32.mrb[11].mxu0  ;;  %3534 = vmatprep.subr.bf16.mxu1 %v3690_v14 }
 0x15a   :  { %v3535_v9 = vpack.c.bf16 %v496_v4, %v495_v5  ;;  %v487_v10 = vadd.f32 %v486_v8, %v3926_v32 }
 0x15b   :  { %v498_v11 = vmax.f32 %v492_v7, 0.0  ;;  %3233 = vmatmul.mubr.msk.f32.vlgmr.msra.gmra.mrb[2].mxu1 %vm166_vm2, %v3957_v49 }
 0x15c   :  { %v497_v12 = vmax.f32 %v487_v10, 0.0  ;;  %3536 = vmatpush3.bf16.msra.mxu1 %v3535_v9  ;;  %v3258_v13 = vpop.f32.mrb[12].mxu0  ;;  %3251 = vmatprep.mubr.msk.f32.mxu1 %vm3691_vm1, %v3692_v31 }
 0x15d   :  { %v646_v15 = vadd.f32 %v3258_v13, %v3928_v33  ;;  %v640_v16 = vpop.f32.mrb[13].mxu0  ;;  %3537 = vmatprep.subr.bf16.mxu1 %v3690_v14 }
 0x15e   :  { %v3538_v17 = vpack.c.bf16 %v498_v11, %v497_v12  ;;  %v641_v18 = vadd.f32 %v640_v16, %v3914_v29 }
 0x15f   :  { %v660_v19 = vmax.f32 %v646_v15, 0.0 }
 0x160   :  { %v659_v20 = vmax.f32 %v641_v18, 0.0  ;;  %3539 = vmatpush3.bf16.msra.mxu1 %v3538_v17  ;;  %v3261_v21 = vpop.f32.mrb[14].mxu0 }
 0x161   :  { %v656_v22 = vadd.f32 %v3261_v21, %v3940_v39  ;;  %v650_v23 = vpop.f32.mrb[15].mxu0  ;;  %3540 = vmatprep.subr.bf16.mxu1 %v3690_v14 }
 0x162   :  { %v3541_v24 = vpack.c.bf16 %v660_v19, %v659_v20  ;;  %v651_v25 = vadd.f32 %v650_v23, %v3926_v32 }
 0x163   :  { %v662_v26 = vmax.f32 %v656_v22, 0.0  ;;  %3252 = vmatmul.mubr.msk.f32.vlgmr.msra.gmra.mrb[4].mxu1 %vm166_vm2, %v3957_v49 }
 0x164   :  { %v661_v27 = vmax.f32 %v651_v25, 0.0  ;;  %3542 = vmatpush3.bf16.msra.mxu1 %v3541_v24  ;;  %v3277_v28 = vpop.f32.mrb[16].mxu0  ;;  %3270 = vmatprep.mubr.msk.f32.mxu1 %vm3691_vm1, %v3692_v31 }
 0x165   :  { %v810_v30 = vadd.f32 %v3277_v28, %v3928_v33  ;;  %v804_v34 = vpop.f32.mrb[17].mxu0  ;;  %3543 = vmatprep.subr.bf16.mxu1 %v3690_v14 }
 0x166   :  { %v3544_v35 = vpack.c.bf16 %v662_v26, %v661_v27  ;;  %v805_v36 = vadd.f32 %v804_v34, %v3914_v29 }
 0x167   :  { %v824_v37 = vmax.f32 %v810_v30, 0.0 }
 0x168   :  { %v823_v38 = vmax.f32 %v805_v36, 0.0  ;;  %3545 = vmatpush3.bf16.msra.mxu1 %v3544_v35  ;;  %v3280_v40 = vpop.f32.mrb[18].mxu0 }
 0x169   :  { %v820_v41 = vadd.f32 %v3280_v40, %v3940_v39  ;;  %v814_v42 = vpop.f32.mrb[19].mxu0  ;;  %3546 = vmatprep.subr.bf16.mxu1 %v3690_v14 }
 0x16a   :  { %v3547_v43 = vpack.c.bf16 %v824_v37, %v823_v38  ;;  %v815_v44 = vadd.f32 %v814_v42, %v3926_v32 }
 0x16b   :  { %v826_v45 = vmax.f32 %v820_v41, 0.0  ;;  %3271 = vmatmul.mubr.msk.f32.vlgmr.msra.gmra.mrb[6].mxu1 %vm166_vm2, %v3957_v49 }
 0x16c   :  { %v825_v46 = vmax.f32 %v815_v44, 0.0  ;;  %3548 = vmatpush3.bf16.msra.mxu1 %v3547_v43  ;;  %v3296_v47 = vpop.f32.mrb[20].mxu0  ;;  %3289 = vmatprep.mubr.msk.f32.mxu1 %vm3691_vm1, %v3692_v31 }
 0x16d   :  { %v974_v48 = vadd.f32 %v3296_v47, %v3928_v33  ;;  %v968_v50 = vpop.f32.mrb[21].mxu0  ;;  %3549 = vmatprep.subr.bf16.mxu1 %v3690_v14 }
 0x16e   :  { %v3550_v51 = vpack.c.bf16 %v826_v45, %v825_v46  ;;  %v969_v52 = vadd.f32 %v968_v50, %v3914_v29 }
 0x16f   :  { %v988_v53 = vmax.f32 %v974_v48, 0.0 }
 0x170   :  { %v987_v54 = vmax.f32 %v969_v52, 0.0  ;;  %3551 = vmatpush3.bf16.msra.mxu1 %v3550_v51  ;;  %v3299_v55 = vpop.f32.mrb[22].mxu0 }
 0x171   :  { %v984_v56 = vadd.f32 %v3299_v55, %v3940_v39  ;;  %v978_v57 = vpop.f32.mrb[23].mxu0  ;;  %3552 = vmatprep.subr.bf16.mxu1 %v3690_v14 }
 0x172   :  { %v3553_v58 = vpack.c.bf16 %v988_v53, %v987_v54  ;;  %v979_v59 = vadd.f32 %v978_v57, %v3926_v32 }
 0x173   :  { %v990_v60 = vmax.f32 %v984_v56, 0.0  ;;  %3290 = vmatmul.mubr.msk.f32.vlgmr.msra.gmra.mrb[8].mxu1 %vm166_vm2, %v3957_v49 }
 0x174   :  { %v989_v61 = vmax.f32 %v979_v59, 0.0  ;;  %3554 = vmatpush3.bf16.msra.mxu1 %v3553_v58  ;;  %v3315_v62 = vpop.f32.mrb[24].mxu0  ;;  %3308 = vmatprep.mubr.msk.f32.mxu1 %vm3691_vm1, %v3692_v31 }
 0x175   :  { %v1138_v63 = vadd.f32 %v3315_v62, %v3928_v33  ;;  %v1132_v0 = vpop.f32.mrb[25].mxu0  ;;  %3555 = vmatprep.subr.bf16.mxu1 %v3690_v14 }
 0x176   :  { %v3556_v1 = vpack.c.bf16 %v990_v60, %v989_v61  ;;  %v1133_v2 = vadd.f32 %v1132_v0, %v3914_v29 }
 0x177   :  { %v1152_v3 = vmax.f32 %v1138_v63, 0.0 }
 0x178   :  { %v1151_v4 = vmax.f32 %v1133_v2, 0.0  ;;  %3557 = vmatpush3.bf16.msra.mxu1 %v3556_v1  ;;  %v3318_v5 = vpop.f32.mrb[26].mxu0 }
 0x179   :  { %v1148_v6 = vadd.f32 %v3318_v5, %v3940_v39  ;;  %v1142_v7 = vpop.f32.mrb[27].mxu0  ;;  %3558 = vmatprep.subr.bf16.mxu1 %v3690_v14 }
 0x17a   :  { %v3559_v8 = vpack.c.bf16 %v1152_v3, %v1151_v4  ;;  %v1143_v9 = vadd.f32 %v1142_v7, %v3926_v32 }
 0x17b   :  { %v1154_v10 = vmax.f32 %v1148_v6, 0.0  ;;  %3309 = vmatmul.mubr.msk.f32.vlgmr.msra.gmra.mrb[10].mxu1 %vm166_vm2, %v3957_v49 }
 0x17c   :  { %v1153_v11 = vmax.f32 %v1143_v9, 0.0  ;;  %3560 = vmatpush3.bf16.msra.mxu1 %v3559_v8  ;;  %v3334_v12 = vpop.f32.mrb[28].mxu0  ;;  %3327 = vmatprep.mubr.msk.f32.mxu1 %vm3691_vm1, %v3692_v31 }
 0x17d   :  { %v1302_v13 = vadd.f32 %v3334_v12, %v3928_v33  ;;  %v1296_v15 = vpop.f32.mrb[29].mxu0  ;;  %3561 = vmatprep.subr.bf16.mxu1 %v3690_v14 }
 0x17e   :  { %v3562_v16 = vpack.c.bf16 %v1154_v10, %v1153_v11  ;;  %v1297_v17 = vadd.f32 %v1296_v15, %v3914_v29 }
 0x17f   :  { %v1316_v18 = vmax.f32 %v1302_v13, 0.0 }
 0x180   :  { %v1315_v19 = vmax.f32 %v1297_v17, 0.0  ;;  %3563 = vmatpush3.bf16.msra.mxu1 %v3562_v16  ;;  %v3337_v20 = vpop.f32.mrb[30].mxu0 }
 0x181   :  { %v1312_v21 = vadd.f32 %v3337_v20, %v3940_v39  ;;  %v1306_v22 = vpop.f32.mrb[31].mxu0  ;;  %3564 = vmatprep.subr.bf16.mxu1 %v3690_v14 }
 0x182   :  { %v3565_v23 = vpack.c.bf16 %v1316_v18, %v1315_v19  ;;  %v1307_v24 = vadd.f32 %v1306_v22, %v3926_v32 }
 0x183   :  { %v1318_v25 = vmax.f32 %v1312_v21, 0.0  ;;  %3328 = vmatmul.mubr.msk.f32.vlgmr.msra.gmra.mrb[12].mxu1 %vm166_vm2, %v3957_v49 }
 0x184   :  { %v1317_v26 = vmax.f32 %v1307_v24, 0.0  ;;  %3566 = vmatpush3.bf16.msra.mxu1 %v3565_v23  ;;  %v3353_v27 = vpop.f32.mrb[32].mxu0  ;;  %3346 = vmatprep.mubr.msk.f32.mxu1 %vm3691_vm1, %v3692_v31 }
 0x185   :  { %v1466_v28 = vadd.f32 %v3353_v27, %v3928_v33  ;;  %v1460_v30 = vpop.f32.mrb[33].mxu0  ;;  %3567 = vmatprep.subr.bf16.mxu1 %v3690_v14 }
 0x186   :  { %v3568_v34 = vpack.c.bf16 %v1318_v25, %v1317_v26  ;;  %v1461_v35 = vadd.f32 %v1460_v30, %v3914_v29 }
 0x187   :  { %v1480_v36 = vmax.f32 %v1466_v28, 0.0 }
 0x188   :  { %v1479_v37 = vmax.f32 %v1461_v35, 0.0  ;;  %3569 = vmatpush3.bf16.msra.mxu1 %v3568_v34  ;;  %v3356_v38 = vpop.f32.mrb[34].mxu0 }
 0x189   :  { %v1476_v40 = vadd.f32 %v3356_v38, %v3940_v39  ;;  %v1470_v41 = vpop.f32.mrb[35].mxu0  ;;  %3570 = vmatprep.subr.bf16.mxu1 %v3690_v14 }
 0x18a   :  { %v3571_v42 = vpack.c.bf16 %v1480_v36, %v1479_v37  ;;  %v1471_v43 = vadd.f32 %v1470_v41, %v3926_v32 }
 0x18b   :  { %v1482_v44 = vmax.f32 %v1476_v40, 0.0  ;;  %3347 = vmatmul.mubr.msk.f32.vlgmr.msra.gmra.mrb[14].mxu1 %vm166_vm2, %v3957_v49 }
 0x18c   :  { %v1481_v45 = vmax.f32 %v1471_v43, 0.0  ;;  %3572 = vmatpush3.bf16.msra.mxu1 %v3571_v42  ;;  %v3372_v46 = vpop.f32.mrb[36].mxu0  ;;  %3365 = vmatprep.mubr.msk.f32.mxu1 %vm3691_vm1, %v3692_v31 }
 0x18d   :  { %v1630_v47 = vadd.f32 %v3372_v46, %v3928_v33  ;;  %v1624_v48 = vpop.f32.mrb[37].mxu0  ;;  %3573 = vmatprep.subr.bf16.mxu1 %v3690_v14 }
 0x18e   :  { %v3574_v50 = vpack.c.bf16 %v1482_v44, %v1481_v45  ;;  %v1625_v51 = vadd.f32 %v1624_v48, %v3914_v29 }
 0x18f   :  { %v1644_v52 = vmax.f32 %v1630_v47, 0.0 }
 0x190   :  { %v1643_v53 = vmax.f32 %v1625_v51, 0.0  ;;  %3575 = vmatpush3.bf16.msra.mxu1 %v3574_v50  ;;  %v3375_v54 = vpop.f32.mrb[38].mxu0 }
 0x191   :  { %v1640_v55 = vadd.f32 %v3375_v54, %v3940_v39  ;;  %v1634_v56 = vpop.f32.mrb[39].mxu0  ;;  %3576 = vmatprep.subr.bf16.mxu1 %v3690_v14 }
 0x192   :  { %v3577_v57 = vpack.c.bf16 %v1644_v52, %v1643_v53  ;;  %v1635_v58 = vadd.f32 %v1634_v56, %v3926_v32 }
 0x193   :  { %v1646_v59 = vmax.f32 %v1640_v55, 0.0  ;;  %3366 = vmatmul.mubr.msk.f32.vlgmr.msra.gmra.mrb[16].mxu1 %vm166_vm2, %v3957_v49 }
 0x194   :  { %v1645_v60 = vmax.f32 %v1635_v58, 0.0  ;;  %3578 = vmatpush3.bf16.msra.mxu1 %v3577_v57  ;;  %v3391_v61 = vpop.f32.mrb[40].mxu0  ;;  %3384 = vmatprep.mubr.msk.f32.mxu1 %vm3691_vm1, %v3692_v31 }
 0x195   :  { %v1794_v62 = vadd.f32 %v3391_v61, %v3928_v33  ;;  %v1788_v63 = vpop.f32.mrb[41].mxu0  ;;  %3579 = vmatprep.subr.bf16.mxu1 %v3690_v14 }
 0x196   :  { %v3580_v0 = vpack.c.bf16 %v1646_v59, %v1645_v60  ;;  %v1789_v1 = vadd.f32 %v1788_v63, %v3914_v29 }
 0x197   :  { %v1808_v2 = vmax.f32 %v1794_v62, 0.0 }
 0x198   :  { %v1807_v3 = vmax.f32 %v1789_v1, 0.0  ;;  %3581 = vmatpush3.bf16.msra.mxu1 %v3580_v0  ;;  %v3394_v4 = vpop.f32.mrb[42].mxu0 }
 0x199   :  { %v1804_v5 = vadd.f32 %v3394_v4, %v3940_v39  ;;  %v1798_v6 = vpop.f32.mrb[43].mxu0  ;;  %3582 = vmatprep.subr.bf16.mxu1 %v3690_v14 }
 0x19a   :  { %v3583_v7 = vpack.c.bf16 %v1808_v2, %v1807_v3  ;;  %v1799_v8 = vadd.f32 %v1798_v6, %v3926_v32 }
 0x19b   :  { %v1810_v9 = vmax.f32 %v1804_v5, 0.0  ;;  %3385 = vmatmul.mubr.msk.f32.vlgmr.msra.gmra.mrb[18].mxu1 %vm166_vm2, %v3957_v49 }
 0x19c   :  { %v1809_v10 = vmax.f32 %v1799_v8, 0.0  ;;  %3584 = vmatpush3.bf16.msra.mxu1 %v3583_v7  ;;  %v3410_v11 = vpop.f32.mrb[44].mxu0  ;;  %3403 = vmatprep.mubr.msk.f32.mxu1 %vm3691_vm1, %v3692_v31 }
 0x19d   :  { %v1958_v12 = vadd.f32 %v3410_v11, %v3928_v33  ;;  %v1952_v13 = vpop.f32.mrb[45].mxu0  ;;  %3585 = vmatprep.subr.bf16.mxu1 %v3690_v14 }
 0x19e   :  { %v3586_v15 = vpack.c.bf16 %v1810_v9, %v1809_v10  ;;  %v1953_v16 = vadd.f32 %v1952_v13, %v3914_v29 }
 0x19f   :  { %v1972_v17 = vmax.f32 %v1958_v12, 0.0 }
 0x1a0   :  { %v1971_v18 = vmax.f32 %v1953_v16, 0.0  ;;  %3587 = vmatpush3.bf16.msra.mxu1 %v3586_v15  ;;  %v3413_v19 = vpop.f32.mrb[46].mxu0 }
 0x1a1   :  { %v1968_v20 = vadd.f32 %v3413_v19, %v3940_v39  ;;  %v1962_v21 = vpop.f32.mrb[47].mxu0  ;;  %3588 = vmatprep.subr.bf16.mxu1 %v3690_v14 }
 0x1a2   :  { %v3589_v22 = vpack.c.bf16 %v1972_v17, %v1971_v18  ;;  %v1963_v23 = vadd.f32 %v1962_v21, %v3926_v32 }
 0x1a3   :  { %v1974_v24 = vmax.f32 %v1968_v20, 0.0  ;;  %3404 = vmatmul.mubr.msk.f32.vlgmr.msra.gmra.mrb[20].mxu1 %vm166_vm2, %v3957_v49 }
 0x1a4   :  { %v1973_v25 = vmax.f32 %v1963_v23, 0.0  ;;  %3590 = vmatpush3.bf16.msra.mxu1 %v3589_v22  ;;  %v3429_v26 = vpop.f32.mrb[48].mxu0  ;;  %3422 = vmatprep.mubr.msk.f32.mxu1 %vm3691_vm1, %v3692_v31 }
 0x1a5   :  { %v2122_v27 = vadd.f32 %v3429_v26, %v3928_v33  ;;  %v2116_v28 = vpop.f32.mrb[49].mxu0  ;;  %3591 = vmatprep.subr.bf16.mxu1 %v3690_v14 }
 0x1a6   :  { %v3592_v30 = vpack.c.bf16 %v1974_v24, %v1973_v25  ;;  %v2117_v34 = vadd.f32 %v2116_v28, %v3914_v29 }
 0x1a7   :  { %v2136_v35 = vmax.f32 %v2122_v27, 0.0 }
 0x1a8   :  { %v2135_v36 = vmax.f32 %v2117_v34, 0.0  ;;  %3593 = vmatpush3.bf16.msra.mxu1 %v3592_v30  ;;  %v3432_v37 = vpop.f32.mrb[50].mxu0 }
 0x1a9   :  { %v2132_v38 = vadd.f32 %v3432_v37, %v3940_v39  ;;  %v2126_v40 = vpop.f32.mrb[51].mxu0  ;;  %3594 = vmatprep.subr.bf16.mxu1 %v3690_v14 }
 0x1aa   :  { %v3595_v41 = vpack.c.bf16 %v2136_v35, %v2135_v36  ;;  %v2127_v42 = vadd.f32 %v2126_v40, %v3926_v32 }
 0x1ab   :  { %v2138_v43 = vmax.f32 %v2132_v38, 0.0  ;;  %3423 = vmatmul.mubr.msk.f32.vlgmr.msra.gmra.mrb[22].mxu1 %vm166_vm2, %v3957_v49 }
 0x1ac   :  { %v2137_v44 = vmax.f32 %v2127_v42, 0.0  ;;  %3596 = vmatpush3.bf16.msra.mxu1 %v3595_v41  ;;  %v3448_v45 = vpop.f32.mrb[52].mxu0  ;;  %3441 = vmatprep.mubr.msk.f32.mxu1 %vm3691_vm1, %v3692_v31 }
 0x1ad   :  { %v2286_v46 = vadd.f32 %v3448_v45, %v3928_v33  ;;  %v2280_v47 = vpop.f32.mrb[53].mxu0  ;;  %3597 = vmatprep.subr.bf16.mxu1 %v3690_v14 }
 0x1ae   :  { %v3598_v48 = vpack.c.bf16 %v2138_v43, %v2137_v44  ;;  %v2281_v50 = vadd.f32 %v2280_v47, %v3914_v29 }
 0x1af   :  { %v2300_v51 = vmax.f32 %v2286_v46, 0.0 }
 0x1b0   :  { %v2299_v52 = vmax.f32 %v2281_v50, 0.0  ;;  %3599 = vmatpush3.bf16.msra.mxu1 %v3598_v48  ;;  %v3451_v53 = vpop.f32.mrb[54].mxu0 }
 0x1b1   :  { %v2296_v54 = vadd.f32 %v3451_v53, %v3940_v39  ;;  %v2290_v55 = vpop.f32.mrb[55].mxu0  ;;  %3600 = vmatprep.subr.bf16.mxu1 %v3690_v14 }
 0x1b2   :  { %v3601_v56 = vpack.c.bf16 %v2300_v51, %v2299_v52  ;;  %v2291_v57 = vadd.f32 %v2290_v55, %v3926_v32 }
 0x1b3   :  { %v2302_v58 = vmax.f32 %v2296_v54, 0.0  ;;  %3442 = vmatmul.mubr.msk.f32.vlgmr.msra.gmra.mrb[24].mxu1 %vm166_vm2, %v3957_v49 }
 0x1b4   :  { %v2301_v59 = vmax.f32 %v2291_v57, 0.0  ;;  %3602 = vmatpush3.bf16.msra.mxu1 %v3601_v56  ;;  %v3467_v60 = vpop.f32.mrb[56].mxu0  ;;  %3460 = vmatprep.mubr.msk.f32.mxu1 %vm3691_vm1, %v3692_v31 }
 0x1b5   :  { %v2450_v61 = vadd.f32 %v3467_v60, %v3928_v33  ;;  %v2444_v62 = vpop.f32.mrb[57].mxu0  ;;  %3603 = vmatprep.subr.bf16.mxu1 %v3690_v14 }
 0x1b6   :  { %v3604_v63 = vpack.c.bf16 %v2302_v58, %v2301_v59  ;;  %v2445_v0 = vadd.f32 %v2444_v62, %v3914_v29  ;;  %v2703_v62 = vld [vmem:[%s4179_s4 + $0x8] sm:$0xff] }
 0x1b7   :  { %v2464_v1 = vmax.f32 %v2450_v61, 0.0 }
 0x1b8   :  { %v2463_v2 = vmax.f32 %v2445_v0, 0.0  ;;  %3605 = vmatpush3.bf16.msra.mxu1 %v3604_v63  ;;  %v3470_v3 = vpop.f32.mrb[58].mxu0  ;;  %v2704_v63 = vld [vmem:[%s4179_s4 + $0x10] sm:$0xff]  ;;  %v2705_v0 = vld [vmem:[%s4179_s4 + $0x18] sm:$0xff] }
 0x1b9   :  { %v2460_v4 = vadd.f32 %v3470_v3, %v3940_v39  ;;  %v2454_v5 = vpop.f32.mrb[59].mxu0  ;;  %3606 = vmatprep.subr.bf16.mxu1 %v3690_v14 }
 0x1ba   :  { %v3607_v6 = vpack.c.bf16 %v2464_v1, %v2463_v2  ;;  %v2455_v7 = vadd.f32 %v2454_v5, %v3926_v32  ;;  %v2720_v1 = vpop.permute.xlu1 %2719  ;;  %v2715_v2 = vpop.permute.xlu0 %2714 }
 0x1bb   :  { %v2466_v8 = vmax.f32 %v2460_v4, 0.0  ;;  %3461 = vmatmul.mubr.msk.f32.vlgmr.msra.gmra.mrb[26].mxu1 %vm166_vm2, %v3957_v49  ;;  %v236_v9 = vpop.f32.mrb[0].mxu1 }
 0x1bc   :  { %v2465_v10 = vmax.f32 %v2455_v7, 0.0  ;;  %3608 = vmatpush3.bf16.msra.mxu1 %v3607_v6  ;;  %v3486_v11 = vpop.f32.mrb[60].mxu0  ;;  %3479 = vmatprep.mubr.msk.f32.mxu1 %vm3691_vm1, %v3692_v31  ;;  %241 = vst.msk [vmem:[#allocation2] sm:$0x1] %vm240_vm3, %v236_v9  ;;  %v3215_v12 = vpop.f32.mrb[1].mxu1 }
 0x1bd   :  { %v2614_v13 = vadd.f32 %v3486_v11, %v3928_v33  ;;  %v2608_v15 = vpop.f32.mrb[61].mxu0  ;;  %3609 = vmatprep.subr.bf16.mxu1 %v3690_v14 }
 0x1be   :  { %v3610_v16 = vpack.c.bf16 %v2466_v8, %v2465_v10  ;;  %v2609_v17 = vadd.f32 %v2608_v15, %v3914_v29  ;;  %v2730_v8 = vpop.permute.xlu1 %2729  ;;  %v2725_v11 = vpop.permute.xlu0 %2724 }
 0x1bf   :  { %v2628_v18 = vmax.f32 %v2614_v13, 0.0 }
 0x1c0   :  { %v2627_v19 = vmax.f32 %v2609_v17, 0.0  ;;  %3611 = vmatpush3.bf16.msra.mxu1 %v3610_v16  ;;  %v3489_v20 = vpop.f32.mrb[62].mxu0 }
 0x1c1   :  { %v2624_v21 = vadd.f32 %v3489_v20, %v3940_v39  ;;  %v2618_v22 = vpop.f32.mrb[63].mxu0  ;;  %3612 = vmatprep.subr.bf16.mxu1 %v3690_v14  ;;  %v2834_v20 = vld [vmem:[%s4181_s6] sm:$0x1] }
 0x1c2   :  { %v3613_v23 = vpack.c.bf16 %v2628_v18, %v2627_v19  ;;  %v2619_v24 = vadd.f32 %v2618_v22, %v3926_v32  ;;  %v2702_v32 = vld [vmem:[%s4179_s4] sm:$0xff] }
 0x1c3   :  { %v2630_v25 = vmax.f32 %v2624_v21, 0.0  ;;  %3480 = vmatmul.mubr.msk.f32.vlgmr.msra.gmra.mrb[28].mxu1 %vm166_vm2, %v3957_v49  ;;  %3505 = vmatprep.mubr.msk.f32.mxu0 %vm2732_vm4, %v2702_v32  ;;  %v2836_v21 = vstv %s4182_s7 }
 0x1c4   :  { %v2629_v33 = vmax.f32 %v2619_v24, 0.0  ;;  %3614 = vmatpush3.bf16.msra.mxu1 %v3613_v23  ;;  %3498 = vmatprep.mubr.msk.f32.mxu1 %vm3691_vm1, %v3692_v31 }
 0x1c5   :  { %3615 = vmatprep.subr.bf16.mxu1 %v3690_v14 }
 0x1c6   :  { %v3616_v29 = vpack.c.bf16 %v2630_v25, %v2629_v33 }
 0x1c8   :  { %3617 = vmatpush3.bf16.msra.mxu1 %v3616_v29 }
 0x1c9   :  { %3622 = vmatprep.subr.bf16.mxu1 %v3690_v14 }
 0x1cb   :  { %3499 = vmatmul.mubr.msk.f32.vlgmr.msra.gmra.mrb[30].mxu1 %vm166_vm2, %v3957_v49 }
 0x1cc   :  { %3519 = vmatprep.mubr.msk.f32.mxu1 %vm3691_vm1, %v3692_v31 }
 0x22e   :  { %v401_v39 = vpop.f32.mrb[2].mxu1 }
 0x22f   :  { %405 = vst.msk [vmem:[#allocation2 + $0x1] sm:$0x1] %vm240_vm3, %v401_v39  ;;  %v3234_v26 = vpop.f32.mrb[3].mxu1 }
 0x236   :  { %v565_v27 = vpop.f32.mrb[4].mxu1 }
 0x237   :  { %569 = vst.msk [vmem:[#allocation2 + $0x2] sm:$0x1] %vm240_vm3, %v565_v27  ;;  %v3253_v28 = vpop.f32.mrb[5].mxu1 }
 0x23e   :  { %v729_v30 = vpop.f32.mrb[6].mxu1 }
 0x23f   :  { %733 = vst.msk [vmem:[#allocation2 + $0x3] sm:$0x1] %vm240_vm3, %v729_v30  ;;  %v3272_v49 = vpop.f32.mrb[7].mxu1 }
 0x246   :  { %v893_v31 = vpop.f32.mrb[8].mxu1 }
 0x247   :  { %897 = vst.msk [vmem:[#allocation2 + $0x4] sm:$0x1] %vm240_vm3, %v893_v31  ;;  %v3291_v34 = vpop.f32.mrb[9].mxu1 }
 0x24e   :  { %v1057_v35 = vpop.f32.mrb[10].mxu1 }
 0x24f   :  { %1061 = vst.msk [vmem:[#allocation2 + $0x5] sm:$0x1] %vm240_vm3, %v1057_v35  ;;  %v3310_v36 = vpop.f32.mrb[11].mxu1 }
 0x256   :  { %v1221_v37 = vpop.f32.mrb[12].mxu1 }
 0x257   :  { %1225 = vst.msk [vmem:[#allocation2 + $0x6] sm:$0x1] %vm240_vm3, %v1221_v37  ;;  %v3329_v38 = vpop.f32.mrb[13].mxu1 }
 0x25e   :  { %v1385_v40 = vpop.f32.mrb[14].mxu1 }
 0x25f   :  { %1389 = vst.msk [vmem:[#allocation2 + $0x7] sm:$0x1] %vm240_vm3, %v1385_v40  ;;  %v3348_v41 = vpop.f32.mrb[15].mxu1 }
 0x266   :  { %v1549_v42 = vpop.f32.mrb[16].mxu1  ;;  %v2706_v59 = vld [vmem:[#allocation2] sm:$0xff] }
 0x267   :  { %1553 = vst.msk [vmem:[#allocation2 + $0x8] sm:$0x1] %vm240_vm3, %v1549_v42  ;;  %v3367_v43 = vpop.f32.mrb[17].mxu1 }
 0x26e   :  { %v1713_v44 = vpop.f32.mrb[18].mxu1 }
 0x26f   :  { %1717 = vst.msk [vmem:[#allocation2 + $0x9] sm:$0x1] %vm240_vm3, %v1713_v44  ;;  %v3386_v45 = vpop.f32.mrb[19].mxu1 }
 0x276   :  { %v1877_v46 = vpop.f32.mrb[20].mxu1 }
 0x277   :  { %1881 = vst.msk [vmem:[#allocation2 + $0xa] sm:$0x1] %vm240_vm3, %v1877_v46  ;;  %v3405_v47 = vpop.f32.mrb[21].mxu1 }
 0x27e   :  { %v2041_v48 = vpop.f32.mrb[22].mxu1 }
 0x27f   :  { %2045 = vst.msk [vmem:[#allocation2 + $0xb] sm:$0x1] %vm240_vm3, %v2041_v48  ;;  %v3424_v50 = vpop.f32.mrb[23].mxu1 }
 0x286   :  { %v2205_v51 = vpop.f32.mrb[24].mxu1 }
 0x287   :  { %2209 = vst.msk [vmem:[#allocation2 + $0xc] sm:$0x1] %vm240_vm3, %v2205_v51  ;;  %v3443_v52 = vpop.f32.mrb[25].mxu1 }
 0x28e   :  { %v2369_v53 = vpop.f32.mrb[26].mxu1 }
 0x28f   :  { %2373 = vst.msk [vmem:[#allocation2 + $0xd] sm:$0x1] %vm240_vm3, %v2369_v53  ;;  %v3462_v54 = vpop.f32.mrb[27].mxu1 }
 0x296   :  { %v2533_v55 = vpop.f32.mrb[28].mxu1 }
 0x297   :  { %2537 = vst.msk [vmem:[#allocation2 + $0xe] sm:$0x1] %vm240_vm3, %v2533_v55  ;;  %v3481_v56 = vpop.f32.mrb[29].mxu1 }
 0x29e   :  { %v2697_v57 = vpop.f32.mrb[30].mxu1 }
 0x29f   :  { %2701 = vst.msk [vmem:[#allocation2 + $0xf] sm:$0x1] %vm240_vm3, %v2697_v57  ;;  %v3500_v58 = vpop.f32.mrb[31].mxu1 }
 0x2a6   :  { %v2707_v60 = vld [vmem:[#allocation2 + $0x8] sm:$0xff] }
 0x2a7   :  { %v3618_v61 = vpack.c.bf16 %v2707_v60, %v2706_v59 }
 0x2a9   :  { %3619 = vmatprep.subr.bf16.mxu0 %v3618_v61 }
 0x2aa   :  { %3621 = vmatpush3.bf16.msra.mxu0 %v3618_v61 }
 0x2ad   :  { %3506 = vmatmul.mubr.msk.f32.vlgmr.msra.gmra.mrb[64].mxu0 %vm2732_vm4, %v2703_v62 }
 0x2ae   :  { %3508 = vmatprep.mubr.msk.f32.mxu0 %vm2732_vm4, %v2704_v63 }
 0x2b1   :  { %3509 = vmatmul.mubr.msk.f32.gmra.mrb[66].mxu0 %vm2732_vm4, %v2705_v0 }
 0x380   :  { %v3507_v3 = vpop.f32.mrb[64].mxu0 }
 0x381   :  { %v2817_v4 = vadd.f32 %v3507_v3, %v2720_v1  ;;  %v2811_v5 = vpop.f32.mrb[65].mxu0 }
 0x382   :  { %v2812_v6 = vadd.f32 %v2811_v5, %v2715_v2 }
 0x383   :  { %v2831_v7 = vmax.f32 %v2817_v4, 0.0 }
 0x384   :  { %v2830_v9 = vmax.f32 %v2812_v6, 0.0  ;;  %v3510_v10 = vpop.f32.mrb[66].mxu0 }
 0x385   :  { %v2827_v12 = vadd.f32 %v3510_v10, %v2730_v8  ;;  %v2821_v13 = vpop.f32.mrb[67].mxu0 }
 0x386   :  { %v3623_v15 = vpack.c.bf16 %v2831_v7, %v2830_v9  ;;  %v2822_v16 = vadd.f32 %v2821_v13, %v2725_v11 }
 0x387   :  { %v2833_v17 = vmax.f32 %v2827_v12, 0.0 }
 0x388   :  { %v2832_v18 = vmax.f32 %v2822_v16, 0.0  ;;  %3624 = vmatpush3.bf16.msra.mxu1 %v3623_v15 }
 0x389   :  { %3625 = vmatprep.subr.bf16.mxu1 %v3690_v14 }
 0x38a   :  { %v3626_v19 = vpack.c.bf16 %v2833_v17, %v2832_v18 }
 0x38c   :  { %3627 = vmatpush3.bf16.msra.mxu1 %v3626_v19 }
 0x38f   :  { %3520 = vmatmul.mubr.msk.f32.vlgmr.msra.gmra.mrb[32].mxu1 %vm166_vm2, %v2834_v20 }
 0x462   :  { %v2906_v22 = vpop.f32.mrb[32].mxu1 }
 0x463   :  { %v2907_v23 = vadd.f32 %v2906_v22, %v2836_v21  ;;  %v3521_v24 = vpop.f32.mrb[33].mxu1 }
 0x465   :  { %2910 = vst.msk [vmem:[#allocation4] sm:$0x1] %vm240_vm3, %v2907_v23 }
 0x466   :  { %3661 = shalt.err (!%p3658_p4)
}
 0x467   :  { %s3662_s7 = scalar_lea.hbm %s4183_s8, 16 }
 0x468   :  { %p3663_p5 = scmp.ne.s32.totalorder %s4183_s8, %s3662_s7  ;;  %p3666_p6 = scmp.lt.u32.totalorder %s3662_s7, %s4183_s8 }
 0x46a   :  { %p3668_p7 = pnand %p3666_p6, %p3663_p5 }
 0x46c   :  { %3671 = shalt.err (!%p3668_p7)
}
 0x46d   :  { %2920 = dma.vmem_to_hbm [thread:$0]  %s2918_s9, 16, %s4183_s8, [#allocation5]  }
 0x46e   :  { %3672 = dma.done.wait [#allocation5], 16  }
 0x46f   :  { %3673 = vsyncadd [#allocation5], 4294967280 }
 0x470   :  { %2924 = vsyncpa [#allocation5], 1 }

</bundles_post_ra>
